<compile_context>
chip_gen: v7x
topology: tpu7x:2x2x1
jax: 0.10.0
libtpu: 0.0.40
codegen_flags: <defaults>
</compile_context>

<pallas_src>
import math
import functools

import jax
import jax.numpy as jnp
from jax.experimental import pallas as pl
from jax.experimental.pallas import tpu as pltpu


# ----------------------------------------------------------------------------
# Fused forward kernel: conv-proj -> num_blocks x TransformerBlock -> vocab proj
# ----------------------------------------------------------------------------
def _transformer_kernel(x_ref, pe_ref, cb_ref, pw_ref,
                        wqkv_ref, bqkv_ref, wo_ref, bo_ref,
                        ln1w_ref, ln1b_ref, wf_ref, bf_ref,
                        ln2w_ref, ln2b_ref,
                        ow_ref, ob_ref,
                        o_ref, *, num_heads, num_blocks, batch, seq):
    B, S, NH, L = batch, seq, num_heads, num_blocks
    H = pw_ref.shape[1]
    hd = H // NH
    BS = B * S
    f32, bf16 = jnp.float32, jnp.bfloat16

    # ---- layer-invariant tensors, built ONCE (JAX does not CSE broadcasts) ----
    pe_bs = jnp.broadcast_to(pe_ref[...][None], (B, S, H)).reshape(BS, H)
    cb_bs = jnp.broadcast_to(cb_ref[...][None], (B, S, H)).reshape(BS, H)

    rows = jax.lax.broadcasted_iota(jnp.int32, (S, S), 0)
    cols = jax.lax.broadcasted_iota(jnp.int32, (S, S), 1)
    amask = jnp.where(cols <= rows, 0.0, -1e30).astype(f32)     # additive causal
    mask_b = jnp.broadcast_to(amask[None], (NH * B, S, S))

    # ---- 1x1 Conv1d, token half only (pos half + conv bias folded into cb) ----
    h = jnp.dot(x_ref[...].astype(bf16), pw_ref[...],
                preferred_element_type=f32) + cb_bs             # (B*S, H) f32

    def layernorm(z, w, b):
        mu = jnp.mean(z, axis=-1, keepdims=True)
        var = jnp.mean(jnp.square(z - mu), axis=-1, keepdims=True)
        return (z - mu) * jax.lax.rsqrt(var + 1e-5) * w[None, :] + b[None, :]

    for l in range(L):                                          # static unroll (tiny L)
        # -- sinusoidal positional encoding (dropout = identity) --
        xb = h + pe_bs                                          # (B*S, H)

        # -- multi-head self-attention (torch.nn.MultiheadAttention, eval) --
        # Single fused in-projection; 1/sqrt(hd) Q scale pre-folded at init.
        qkv = jnp.dot(xb.astype(bf16), wqkv_ref[l],
                      preferred_element_type=f32) + bqkv_ref[l][None, :]

        # Head split: lane slices stacked along a leading batch axis
        # (index = group*B + b, group = which*NH + head). No lane-dim concat.
        heads = jnp.concatenate(
            [qkv[:, g * hd:(g + 1) * hd].reshape(B, S, hd) for g in range(3 * NH)],
            axis=0)                                             # (3*NH*B, S, hd)
        qh = heads[0 * NH * B:1 * NH * B].astype(bf16)          # (NH*B, S, hd)
        kh = heads[1 * NH * B:2 * NH * B].astype(bf16)
        vh = heads[2 * NH * B:3 * NH * B].astype(bf16)

        s = jnp.einsum('bqd,bkd->bqk', qh, kh, preferred_element_type=f32)
        s = s + mask_b                                          # additive causal mask
        s = s - jnp.max(s, axis=-1, keepdims=True)              # stable softmax (f32)
        p = jnp.exp(s)
        p = p * pl.reciprocal(jnp.sum(p, axis=-1, keepdims=True), approx=False)
        ctx = jnp.einsum('bqk,bkd->bqd', p.astype(bf16), vh,
                         preferred_element_type=f32)            # (NH*B, S, hd)

        # Head merge + out-projection WITHOUT a lane concat: batched per-head
        # matmul against the row-blocked Wo, then a cheap leading-axis sum.
        ctx_h = ctx.reshape(NH, BS, hd).astype(bf16)            # (NH, B*S, hd)
        po = jnp.einsum('hnd,hdk->hnk', ctx_h, wo_ref[l],
                        preferred_element_type=f32)             # (NH, B*S, H)
        attn = jnp.sum(po, axis=0) + bo_ref[l][None, :]         # (B*S, H)

        # -- residual + layernorm, relu FFN, residual + layernorm --
        n1 = layernorm(xb + attn, ln1w_ref[l], ln1b_ref[l])
        f = jnp.maximum(
            jnp.dot(n1.astype(bf16), wf_ref[l],
                    preferred_element_type=f32) + bf_ref[l][None, :], 0.0)
        h = layernorm(n1 + f, ln2w_ref[l], ln2b_ref[l])

    # -- lane-dense vocab projection: padded to 128 lanes, wrapper slices [:V] --
    o_ref[...] = jnp.dot(h.astype(bf16), ow_ref[...],
                         preferred_element_type=f32) + ob_ref[...]


# ----------------------------------------------------------------------------
# One-time parameter preparation: transpose / stack / bf16-cast weights, fold
# the attention Q scale, the positional conv half and the PE table.
# ----------------------------------------------------------------------------
def prepare_params(params, num_heads, seq_len, lane_pad=128):
    H = params["proj_w"].shape[0]
    E = params["token_embedding"].shape[1]
    hd = H // num_heads
    scale = 1.0 / math.sqrt(hd)
    bf16 = jnp.bfloat16
    blocks = params["blocks"]

    def stack_vec(k):                                   # (N,) per block -> (L, N)
        return jnp.stack([bp[k] for bp in blocks], axis=0)

    wqkv_t = jnp.stack([bp["wqkv"].T for bp in blocks], axis=0)    # (L, H, 3H)
    wqkv_t = wqkv_t.at[:, :, :H].multiply(scale)        # fold 1/sqrt(hd) into Q weight
    bqkv = stack_vec("bqkv").at[:, :H].multiply(scale)  # ... and Q bias  (L, 3H)

    # Out-projection weight, transposed and row-blocked per head: (L, NH, hd, H).
    wo3 = jnp.stack([bp["wo"].T.reshape(num_heads, hd, H) for bp in blocks], axis=0)

    # Sinusoidal PE table over the hidden dim (first seq_len rows), built once.
    position = jnp.arange(seq_len, dtype=jnp.float32)[:, None]
    div_term = jnp.exp(
        jnp.arange(0, H, 2, dtype=jnp.float32) * (-math.log(10000.0) / H))
    pe = jnp.zeros((seq_len, H), jnp.float32)
    pe = pe.at[:, 0::2].set(jnp.sin(position * div_term))
    pe = pe.at[:, 1::2].set(jnp.cos(position * div_term))

    # Fold the pos-embedding half of the 1x1 conv (+ conv bias) into (S, H).
    pos_ids = jnp.arange(seq_len, dtype=jnp.int32) % 3            # [0,1,2,0,...]
    pos = jnp.take(params["pos_embedding"], pos_ids, axis=0)      # (S, E)
    conv_bias = pos @ params["proj_w"][:, E:].T + params["proj_b"][None, :]

    # Lane-dense output projection: pad V -> 128 lanes with zeros.
    V = params["out_w"].shape[0]
    ow_pad = jnp.zeros((H, lane_pad), jnp.float32).at[:, :V].set(params["out_w"].T)
    ob_pad = jnp.zeros((1, lane_pad), jnp.float32).at[0, :V].set(params["out_b"])

    return {
        "token_embedding": params["token_embedding"],             # (V, E) f32
        "pe": pe,                                                 # (S, H) f32
        "conv_bias": conv_bias,                                   # (S, H) f32
        "proj_tok_w_t": params["proj_w"][:, :E].T.astype(bf16),   # (E, H) bf16
        "wqkv_t": wqkv_t.astype(bf16),                            # (L, H, 3H) bf16
        "bqkv": bqkv,                                             # (L, 3H) f32
        "wo3": wo3.astype(bf16),                                  # (L, NH, hd, H) bf16
        "bo": stack_vec("bo"),
        "ln1w": stack_vec("ln1w"), "ln1b": stack_vec("ln1b"),
        "wf_t": jnp.stack([bp["wf"].T for bp in blocks], axis=0).astype(bf16),
        "bf": stack_vec("bf"),
        "ln2w": stack_vec("ln2w"), "ln2b": stack_vec("ln2b"),
        "out_w_t": ow_pad.astype(bf16),                           # (H, 128) bf16
        "out_b": ob_pad,                                          # (1, 128) f32
    }


# ----------------------------------------------------------------------------
# Full SimpleTransformer forward (jitted: gather + one pallas_call + reshape)
# ----------------------------------------------------------------------------
@functools.partial(jax.jit, static_argnames=("num_heads", "vocab_size"))
def simple_transformer_forward(token_ids, prepped, *, num_heads, vocab_size):
    B, S = token_ids.shape
    E = prepped["token_embedding"].shape[1]
    Vp = prepped["out_w_t"].shape[1]                    # 128 (lane-padded)
    num_blocks = prepped["wqkv_t"].shape[0]

    # Token embedding gather (data-dependent; plain-JAX glue inside the jit).
    tok2d = jnp.take(prepped["token_embedding"], token_ids, axis=0).reshape(B * S, E)

    operands = (
        tok2d, prepped["pe"], prepped["conv_bias"], prepped["proj_tok_w_t"],
        prepped["wqkv_t"], prepped["bqkv"], prepped["wo3"], prepped["bo"],
        prepped["ln1w"], prepped["ln1b"], prepped["wf_t"], prepped["bf"],
        prepped["ln2w"], prepped["ln2b"], prepped["out_w_t"], prepped["out_b"],
    )

    def full_spec(a):
        n = a.ndim
        return pl.BlockSpec(a.shape, lambda: (0,) * n)

    kern = functools.partial(_transformer_kernel, num_heads=num_heads,
                             num_blocks=num_blocks, batch=B, seq=S)

    out2d = pl.pallas_call(
        kern,
        out_shape=jax.ShapeDtypeStruct((B * S, Vp), jnp.float32),
        in_specs=[full_spec(a) for a in operands],
        out_specs=pl.BlockSpec((B * S, Vp), lambda: (0, 0)),
        compiler_params=pltpu.CompilerParams(vmem_limit_bytes=32 * 1024 * 1024),
    )(*operands)

    # Strip the lane padding; output.permute(1, 0, 2) in the reference -> (S, B, V).
    out = out2d[:, :vocab_size].reshape(B, S, vocab_size)
    return jnp.transpose(out, (1, 0, 2))


# ----------------------------------------------------------------------------
# Deterministic parameter init + run
# ----------------------------------------------------------------------------
if __name__ == "__main__":
    B, S = 2, 8
    embed_dim, hidden_dim = 16, 32
    num_blocks, num_heads, vocab_size = 2, 4, 64

    key = jax.random.PRNGKey(0)
    keys = iter(jax.random.split(key, 64))

    def init(shape):
        return jax.random.normal(next(keys), shape, dtype=jnp.float32) * 0.05

    params = {
        "token_embedding": init((vocab_size, embed_dim)),
        "pos_embedding": init((3, embed_dim)),
        # Conv1d(2E, H, kernel=1) weight (H, 2E, 1) stored squeezed as (H, 2E)
        "proj_w": init((hidden_dim, 2 * embed_dim)),
        "proj_b": init((hidden_dim,)),
        "out_w": init((vocab_size, hidden_dim)),
        "out_b": init((vocab_size,)),
        "blocks": [],
    }
    for _ in range(num_blocks):
        params["blocks"].append({
            "wqkv": init((3 * hidden_dim, hidden_dim)),
            "bqkv": init((3 * hidden_dim,)),
            "wo": init((hidden_dim, hidden_dim)),
            "bo": init((hidden_dim,)),
            "ln1w": jnp.ones((hidden_dim,), jnp.float32),
            "ln1b": jnp.zeros((hidden_dim,), jnp.float32),
            "wf": init((hidden_dim, hidden_dim)),
            "bf": init((hidden_dim,)),
            "ln2w": jnp.ones((hidden_dim,), jnp.float32),
            "ln2b": jnp.zeros((hidden_dim,), jnp.float32),
        })

    prepped = prepare_params(params, num_heads, seq_len=S)
    token_ids = jax.random.randint(next(keys), (B, S), 0, vocab_size, dtype=jnp.int32)

    out = simple_transformer_forward(token_ids, prepped,
                                     num_heads=num_heads, vocab_size=vocab_size)
    out = jax.block_until_ready(out)
    assert out.shape == (S, B, vocab_size), out.shape
    assert bool(jnp.all(jnp.isfinite(out)))
    print("KERNEL_OK")
</pallas_src>

<mosaic_0001>
module attributes {stable_mosaic.version = 11 : i64} {
  func.func @_transformer_kernel(%arg0: memref<16x16xf32, #tpu.memory_space<vmem>>, %arg1: memref<8x32xf32, #tpu.memory_space<vmem>>, %arg2: memref<8x32xf32, #tpu.memory_space<vmem>>, %arg3: memref<16x32xbf16, #tpu.memory_space<vmem>>, %arg4: memref<2x32x96xbf16, #tpu.memory_space<vmem>>, %arg5: memref<2x96xf32, #tpu.memory_space<vmem>>, %arg6: memref<2x4x8x32xbf16, #tpu.memory_space<vmem>>, %arg7: memref<2x32xf32, #tpu.memory_space<vmem>>, %arg8: memref<2x32xf32, #tpu.memory_space<vmem>>, %arg9: memref<2x32xf32, #tpu.memory_space<vmem>>, %arg10: memref<2x32x32xbf16, #tpu.memory_space<vmem>>, %arg11: memref<2x32xf32, #tpu.memory_space<vmem>>, %arg12: memref<2x32xf32, #tpu.memory_space<vmem>>, %arg13: memref<2x32xf32, #tpu.memory_space<vmem>>, %arg14: memref<32x128xbf16, #tpu.memory_space<vmem>>, %arg15: memref<1x128xf32, #tpu.memory_space<vmem>>, %arg16: memref<16x128xf32, #tpu.memory_space<vmem>>) attributes {dimension_semantics = [], scalar_prefetch = 0 : i64, scratch_operands = 0 : i64, tpu.core_type = #tpu.core_type<tc>} {
    %c0 = arith.constant 0 : index
    %c0_0 = arith.constant 0 : index
    %0 = vector.load %arg1[%c0, %c0_0] : memref<8x32xf32, #tpu.memory_space<vmem>>, vector<8x32xf32>
    %1 = vector.shape_cast %0 : vector<8x32xf32> to vector<1x8x32xf32>
    %2 = vector.shape_cast %1 : vector<1x8x32xf32> to vector<1x8x32xf32>
    %3 = vector.broadcast %2 : vector<1x8x32xf32> to vector<2x8x32xf32>
    %4 = vector.shape_cast %3 : vector<2x8x32xf32> to vector<16x32xf32>
    %c0_1 = arith.constant 0 : index
    %c0_2 = arith.constant 0 : index
    %5 = vector.load %arg2[%c0_1, %c0_2] : memref<8x32xf32, #tpu.memory_space<vmem>>, vector<8x32xf32>
    %6 = vector.shape_cast %5 : vector<8x32xf32> to vector<1x8x32xf32>
    %7 = vector.shape_cast %6 : vector<1x8x32xf32> to vector<1x8x32xf32>
    %8 = vector.broadcast %7 : vector<1x8x32xf32> to vector<2x8x32xf32>
    %9 = vector.shape_cast %8 : vector<2x8x32xf32> to vector<16x32xf32>
    %10 = tpu.iota {dimensions = array<i32: 0>} : vector<8x8xi32>
    %11 = tpu.iota {dimensions = array<i32: 1>} : vector<8x8xi32>
    %12 = arith.cmpi sle, %11, %10 : vector<8x8xi32>
    %cst = arith.constant 0.000000e+00 : f32
    %cst_3 = arith.constant -1.000000e+30 : f32
    %13 = vector.broadcast %cst : f32 to vector<8x8xf32>
    %14 = vector.broadcast %cst_3 : f32 to vector<8x8xf32>
    %15 = arith.select %12, %13, %14 : vector<8x8xi1>, vector<8x8xf32>
    %16 = vector.shape_cast %15 : vector<8x8xf32> to vector<1x8x8xf32>
    %17 = vector.shape_cast %16 : vector<1x8x8xf32> to vector<1x8x8xf32>
    %18 = vector.broadcast %17 : vector<1x8x8xf32> to vector<8x8x8xf32>
    %c0_4 = arith.constant 0 : index
    %c0_5 = arith.constant 0 : index
    %19 = vector.load %arg0[%c0_4, %c0_5] : memref<16x16xf32, #tpu.memory_space<vmem>>, vector<16x16xf32>
    %20 = arith.truncf %19 : vector<16x16xf32> to vector<16x16xbf16>
    %c0_6 = arith.constant 0 : index
    %c0_7 = arith.constant 0 : index
    %21 = vector.load %arg3[%c0_6, %c0_7] : memref<16x32xbf16, #tpu.memory_space<vmem>>, vector<16x32xbf16>
    %cst_8 = arith.constant dense<0.000000e+00> : vector<16x32xf32>
    %22 = tpu.matmul %20, %21, %cst_8 {dimension_numbers = #tpu.dot_dimension_numbers<[1], [0], [0], [1], [0, 0, 1, 1], [], []>} : vector<16x16xbf16>, vector<16x32xbf16>, vector<16x32xf32> -> vector<16x32xf32>
    %23 = arith.addf %22, %9 : vector<16x32xf32>
    %24 = arith.addf %23, %4 : vector<16x32xf32>
    %25 = arith.truncf %24 : vector<16x32xf32> to vector<16x32xbf16>
    %c0_9 = arith.constant 0 : index
    %c0_10 = arith.constant 0 : index
    %c0_11 = arith.constant 0 : index
    %26 = vector.load %arg4[%c0_9, %c0_10, %c0_11] : memref<2x32x96xbf16, #tpu.memory_space<vmem>>, vector<1x32x96xbf16>
    %27 = vector.shape_cast %26 : vector<1x32x96xbf16> to vector<32x96xbf16>
    %cst_12 = arith.constant dense<0.000000e+00> : vector<16x96xf32>
    %28 = tpu.matmul %25, %27, %cst_12 {dimension_numbers = #tpu.dot_dimension_numbers<[1], [0], [0], [1], [0, 0, 1, 1], [], []>} : vector<16x32xbf16>, vector<32x96xbf16>, vector<16x96xf32> -> vector<16x96xf32>
    %c0_13 = arith.constant 0 : index
    %c0_14 = arith.constant 0 : index
    %29 = vector.load %arg5[%c0_13, %c0_14] : memref<2x96xf32, #tpu.memory_space<vmem>>, vector<1x96xf32>
    %30 = vector.shape_cast %29 : vector<1x96xf32> to vector<96xf32>
    %31 = vector.shape_cast %30 : vector<96xf32> to vector<1x96xf32>
    %32 = vector.broadcast %31 : vector<1x96xf32> to vector<16x96xf32>
    %33 = arith.addf %28, %32 : vector<16x96xf32>
    %34 = vector.extract_strided_slice %33 {offsets = [0, 0], sizes = [16, 8], strides = [1, 1]} : vector<16x96xf32> to vector<16x8xf32>
    %35 = vector.shape_cast %34 : vector<16x8xf32> to vector<2x8x8xf32>
    %36 = vector.extract_strided_slice %33 {offsets = [0, 8], sizes = [16, 8], strides = [1, 1]} : vector<16x96xf32> to vector<16x8xf32>
    %37 = vector.shape_cast %36 : vector<16x8xf32> to vector<2x8x8xf32>
    %38 = vector.extract_strided_slice %33 {offsets = [0, 16], sizes = [16, 8], strides = [1, 1]} : vector<16x96xf32> to vector<16x8xf32>
    %39 = vector.shape_cast %38 : vector<16x8xf32> to vector<2x8x8xf32>
    %40 = vector.extract_strided_slice %33 {offsets = [0, 24], sizes = [16, 8], strides = [1, 1]} : vector<16x96xf32> to vector<16x8xf32>
    %41 = vector.shape_cast %40 : vector<16x8xf32> to vector<2x8x8xf32>
    %42 = vector.extract_strided_slice %33 {offsets = [0, 32], sizes = [16, 8], strides = [1, 1]} : vector<16x96xf32> to vector<16x8xf32>
    %43 = vector.shape_cast %42 : vector<16x8xf32> to vector<2x8x8xf32>
    %44 = vector.extract_strided_slice %33 {offsets = [0, 40], sizes = [16, 8], strides = [1, 1]} : vector<16x96xf32> to vector<16x8xf32>
    %45 = vector.shape_cast %44 : vector<16x8xf32> to vector<2x8x8xf32>
    %46 = vector.extract_strided_slice %33 {offsets = [0, 48], sizes = [16, 8], strides = [1, 1]} : vector<16x96xf32> to vector<16x8xf32>
    %47 = vector.shape_cast %46 : vector<16x8xf32> to vector<2x8x8xf32>
    %48 = vector.extract_strided_slice %33 {offsets = [0, 56], sizes = [16, 8], strides = [1, 1]} : vector<16x96xf32> to vector<16x8xf32>
    %49 = vector.shape_cast %48 : vector<16x8xf32> to vector<2x8x8xf32>
    %50 = vector.extract_strided_slice %33 {offsets = [0, 64], sizes = [16, 8], strides = [1, 1]} : vector<16x96xf32> to vector<16x8xf32>
    %51 = vector.shape_cast %50 : vector<16x8xf32> to vector<2x8x8xf32>
    %52 = vector.extract_strided_slice %33 {offsets = [0, 72], sizes = [16, 8], strides = [1, 1]} : vector<16x96xf32> to vector<16x8xf32>
    %53 = vector.shape_cast %52 : vector<16x8xf32> to vector<2x8x8xf32>
    %54 = vector.extract_strided_slice %33 {offsets = [0, 80], sizes = [16, 8], strides = [1, 1]} : vector<16x96xf32> to vector<16x8xf32>
    %55 = vector.shape_cast %54 : vector<16x8xf32> to vector<2x8x8xf32>
    %56 = vector.extract_strided_slice %33 {offsets = [0, 88], sizes = [16, 8], strides = [1, 1]} : vector<16x96xf32> to vector<16x8xf32>
    %57 = vector.shape_cast %56 : vector<16x8xf32> to vector<2x8x8xf32>
    %58 = tpu.concatenate %35, %37, %39, %41, %43, %45, %47, %49, %51, %53, %55, %57 in 0 : vector<2x8x8xf32>, vector<2x8x8xf32>, vector<2x8x8xf32>, vector<2x8x8xf32>, vector<2x8x8xf32>, vector<2x8x8xf32>, vector<2x8x8xf32>, vector<2x8x8xf32>, vector<2x8x8xf32>, vector<2x8x8xf32>, vector<2x8x8xf32>, vector<2x8x8xf32> -> vector<24x8x8xf32>
    %59 = vector.extract_strided_slice %58 {offsets = [0, 0, 0], sizes = [8, 8, 8], strides = [1, 1, 1]} : vector<24x8x8xf32> to vector<8x8x8xf32>
    %60 = arith.truncf %59 : vector<8x8x8xf32> to vector<8x8x8xbf16>
    %61 = vector.extract_strided_slice %58 {offsets = [8, 0, 0], sizes = [8, 8, 8], strides = [1, 1, 1]} : vector<24x8x8xf32> to vector<8x8x8xf32>
    %62 = arith.truncf %61 : vector<8x8x8xf32> to vector<8x8x8xbf16>
    %63 = vector.extract_strided_slice %58 {offsets = [16, 0, 0], sizes = [8, 8, 8], strides = [1, 1, 1]} : vector<24x8x8xf32> to vector<8x8x8xf32>
    %64 = arith.truncf %63 : vector<8x8x8xf32> to vector<8x8x8xbf16>
    "tpu.trace_start"() <{level = 10 : i32, message = "bqd,bkd->bqk"}> : () -> ()
    %cst_15 = arith.constant dense<0.000000e+00> : vector<8x8x8xf32>
    %65 = tpu.matmul %60, %62, %cst_15 {dimension_numbers = #tpu.dot_dimension_numbers<[2], [2], [1], [1], [0, 0, 0, 1, 1, 1], [0], [0]>} : vector<8x8x8xbf16>, vector<8x8x8xbf16>, vector<8x8x8xf32> -> vector<8x8x8xf32>
    "tpu.trace_stop"() : () -> ()
    %66 = arith.addf %65, %18 : vector<8x8x8xf32>
    %cst_16 = arith.constant dense<0xFF800000> : vector<8x8xf32>
    %67 = vector.multi_reduction <maximumf>, %66, %cst_16 [2] : vector<8x8x8xf32> to vector<8x8xf32>
    %68 = vector.shape_cast %67 : vector<8x8xf32> to vector<8x8x1xf32>
    %69 = vector.broadcast %68 : vector<8x8x1xf32> to vector<8x8x8xf32>
    %70 = arith.subf %66, %69 : vector<8x8x8xf32>
    %71 = math.exp %70 : vector<8x8x8xf32>
    %cst_17 = arith.constant dense<0.000000e+00> : vector<8x8xf32>
    %72 = vector.multi_reduction <add>, %71, %cst_17 [2] : vector<8x8x8xf32> to vector<8x8xf32>
    %73 = vector.shape_cast %72 : vector<8x8xf32> to vector<8x8x1xf32>
    %74 = tpu.reciprocal %73 : vector<8x8x1xf32> -> vector<8x8x1xf32>
    %75 = vector.broadcast %74 : vector<8x8x1xf32> to vector<8x8x8xf32>
    %76 = arith.mulf %71, %75 : vector<8x8x8xf32>
    %77 = arith.truncf %76 : vector<8x8x8xf32> to vector<8x8x8xbf16>
    "tpu.trace_start"() <{level = 10 : i32, message = "bqk,bkd->bqd"}> : () -> ()
    %cst_18 = arith.constant dense<0.000000e+00> : vector<8x8x8xf32>
    %78 = tpu.matmul %77, %64, %cst_18 {dimension_numbers = #tpu.dot_dimension_numbers<[2], [1], [1], [2], [0, 0, 0, 1, 1, 2], [0], [0]>} : vector<8x8x8xbf16>, vector<8x8x8xbf16>, vector<8x8x8xf32> -> vector<8x8x8xf32>
    "tpu.trace_stop"() : () -> ()
    %79 = vector.shape_cast %78 : vector<8x8x8xf32> to vector<4x16x8xf32>
    %80 = arith.truncf %79 : vector<4x16x8xf32> to vector<4x16x8xbf16>
    %c0_19 = arith.constant 0 : index
    %c0_20 = arith.constant 0 : index
    %c0_21 = arith.constant 0 : index
    %c0_22 = arith.constant 0 : index
    %81 = vector.load %arg6[%c0_19, %c0_20, %c0_21, %c0_22] : memref<2x4x8x32xbf16, #tpu.memory_space<vmem>>, vector<1x4x8x32xbf16>
    %82 = vector.shape_cast %81 : vector<1x4x8x32xbf16> to vector<4x8x32xbf16>
    "tpu.trace_start"() <{level = 10 : i32, message = "hnd,hdk->hnk"}> : () -> ()
    %cst_23 = arith.constant dense<0.000000e+00> : vector<4x16x32xf32>
    %83 = tpu.matmul %80, %82, %cst_23 {dimension_numbers = #tpu.dot_dimension_numbers<[2], [1], [1], [2], [0, 0, 0, 1, 1, 2], [0], [0]>} : vector<4x16x8xbf16>, vector<4x8x32xbf16>, vector<4x16x32xf32> -> vector<4x16x32xf32>
    "tpu.trace_stop"() : () -> ()
    %cst_24 = arith.constant dense<0.000000e+00> : vector<16x32xf32>
    %84 = vector.multi_reduction <add>, %83, %cst_24 [0] : vector<4x16x32xf32> to vector<16x32xf32>
    %c0_25 = arith.constant 0 : index
    %c0_26 = arith.constant 0 : index
    %85 = vector.load %arg7[%c0_25, %c0_26] : memref<2x32xf32, #tpu.memory_space<vmem>>, vector<1x32xf32>
    %86 = vector.shape_cast %85 : vector<1x32xf32> to vector<32xf32>
    %87 = vector.shape_cast %86 : vector<32xf32> to vector<1x32xf32>
    %88 = vector.broadcast %87 : vector<1x32xf32> to vector<16x32xf32>
    %89 = arith.addf %84, %88 : vector<16x32xf32>
    %90 = arith.addf %24, %89 : vector<16x32xf32>
    %c0_27 = arith.constant 0 : index
    %c0_28 = arith.constant 0 : index
    %91 = vector.load %arg8[%c0_27, %c0_28] : memref<2x32xf32, #tpu.memory_space<vmem>>, vector<1x32xf32>
    %92 = vector.shape_cast %91 : vector<1x32xf32> to vector<32xf32>
    %c0_29 = arith.constant 0 : index
    %c0_30 = arith.constant 0 : index
    %93 = vector.load %arg9[%c0_29, %c0_30] : memref<2x32xf32, #tpu.memory_space<vmem>>, vector<1x32xf32>
    %94 = vector.shape_cast %93 : vector<1x32xf32> to vector<32xf32>
    %cst_31 = arith.constant dense<0.000000e+00> : vector<16xf32>
    %95 = vector.multi_reduction <add>, %90, %cst_31 [1] : vector<16x32xf32> to vector<16xf32>
    %96 = vector.shape_cast %95 : vector<16xf32> to vector<16x1xf32>
    %cst_32 = arith.constant 3.200000e+01 : f32
    %97 = vector.broadcast %cst_32 : f32 to vector<16x1xf32>
    %98 = arith.divf %96, %97 : vector<16x1xf32>
    %99 = vector.broadcast %98 : vector<16x1xf32> to vector<16x32xf32>
    %100 = arith.subf %90, %99 : vector<16x32xf32>
    %101 = arith.mulf %100, %100 : vector<16x32xf32>
    %cst_33 = arith.constant dense<0.000000e+00> : vector<16xf32>
    %102 = vector.multi_reduction <add>, %101, %cst_33 [1] : vector<16x32xf32> to vector<16xf32>
    %103 = vector.shape_cast %102 : vector<16xf32> to vector<16x1xf32>
    %cst_34 = arith.constant 3.200000e+01 : f32
    %104 = vector.broadcast %cst_34 : f32 to vector<16x1xf32>
    %105 = arith.divf %103, %104 : vector<16x1xf32>
    %106 = vector.broadcast %98 : vector<16x1xf32> to vector<16x32xf32>
    %107 = arith.subf %90, %106 : vector<16x32xf32>
    %cst_35 = arith.constant 9.99999974E-6 : f32
    %108 = vector.broadcast %cst_35 : f32 to vector<16x1xf32>
    %109 = arith.addf %105, %108 : vector<16x1xf32>
    %110 = math.rsqrt %109 : vector<16x1xf32>
    %111 = vector.broadcast %110 : vector<16x1xf32> to vector<16x32xf32>
    %112 = arith.mulf %107, %111 : vector<16x32xf32>
    %113 = vector.shape_cast %92 : vector<32xf32> to vector<1x32xf32>
    %114 = vector.broadcast %113 : vector<1x32xf32> to vector<16x32xf32>
    %115 = arith.mulf %112, %114 : vector<16x32xf32>
    %116 = vector.shape_cast %94 : vector<32xf32> to vector<1x32xf32>
    %117 = vector.broadcast %116 : vector<1x32xf32> to vector<16x32xf32>
    %118 = arith.addf %115, %117 : vector<16x32xf32>
    %119 = arith.truncf %118 : vector<16x32xf32> to vector<16x32xbf16>
    %c0_36 = arith.constant 0 : index
    %c0_37 = arith.constant 0 : index
    %c0_38 = arith.constant 0 : index
    %120 = vector.load %arg10[%c0_36, %c0_37, %c0_38] : memref<2x32x32xbf16, #tpu.memory_space<vmem>>, vector<1x32x32xbf16>
    %121 = vector.shape_cast %120 : vector<1x32x32xbf16> to vector<32x32xbf16>
    %cst_39 = arith.constant dense<0.000000e+00> : vector<16x32xf32>
    %122 = tpu.matmul %119, %121, %cst_39 {dimension_numbers = #tpu.dot_dimension_numbers<[1], [0], [0], [1], [0, 0, 1, 1], [], []>} : vector<16x32xbf16>, vector<32x32xbf16>, vector<16x32xf32> -> vector<16x32xf32>
    %c0_40 = arith.constant 0 : index
    %c0_41 = arith.constant 0 : index
    %123 = vector.load %arg11[%c0_40, %c0_41] : memref<2x32xf32, #tpu.memory_space<vmem>>, vector<1x32xf32>
    %124 = vector.shape_cast %123 : vector<1x32xf32> to vector<32xf32>
    %125 = vector.shape_cast %124 : vector<32xf32> to vector<1x32xf32>
    %126 = vector.broadcast %125 : vector<1x32xf32> to vector<16x32xf32>
    %127 = arith.addf %122, %126 : vector<16x32xf32>
    %cst_42 = arith.constant 0.000000e+00 : f32
    %128 = vector.broadcast %cst_42 : f32 to vector<16x32xf32>
    %129 = arith.maximumf %127, %128 : vector<16x32xf32>
    %130 = arith.addf %118, %129 : vector<16x32xf32>
    %c0_43 = arith.constant 0 : index
    %c0_44 = arith.constant 0 : index
    %131 = vector.load %arg12[%c0_43, %c0_44] : memref<2x32xf32, #tpu.memory_space<vmem>>, vector<1x32xf32>
    %132 = vector.shape_cast %131 : vector<1x32xf32> to vector<32xf32>
    %c0_45 = arith.constant 0 : index
    %c0_46 = arith.constant 0 : index
    %133 = vector.load %arg13[%c0_45, %c0_46] : memref<2x32xf32, #tpu.memory_space<vmem>>, vector<1x32xf32>
    %134 = vector.shape_cast %133 : vector<1x32xf32> to vector<32xf32>
    %cst_47 = arith.constant dense<0.000000e+00> : vector<16xf32>
    %135 = vector.multi_reduction <add>, %130, %cst_47 [1] : vector<16x32xf32> to vector<16xf32>
    %136 = vector.shape_cast %135 : vector<16xf32> to vector<16x1xf32>
    %cst_48 = arith.constant 3.200000e+01 : f32
    %137 = vector.broadcast %cst_48 : f32 to vector<16x1xf32>
    %138 = arith.divf %136, %137 : vector<16x1xf32>
    %139 = vector.broadcast %138 : vector<16x1xf32> to vector<16x32xf32>
    %140 = arith.subf %130, %139 : vector<16x32xf32>
    %141 = arith.mulf %140, %140 : vector<16x32xf32>
    %cst_49 = arith.constant dense<0.000000e+00> : vector<16xf32>
    %142 = vector.multi_reduction <add>, %141, %cst_49 [1] : vector<16x32xf32> to vector<16xf32>
    %143 = vector.shape_cast %142 : vector<16xf32> to vector<16x1xf32>
    %cst_50 = arith.constant 3.200000e+01 : f32
    %144 = vector.broadcast %cst_50 : f32 to vector<16x1xf32>
    %145 = arith.divf %143, %144 : vector<16x1xf32>
    %146 = vector.broadcast %138 : vector<16x1xf32> to vector<16x32xf32>
    %147 = arith.subf %130, %146 : vector<16x32xf32>
    %cst_51 = arith.constant 9.99999974E-6 : f32
    %148 = vector.broadcast %cst_51 : f32 to vector<16x1xf32>
    %149 = arith.addf %145, %148 : vector<16x1xf32>
    %150 = math.rsqrt %149 : vector<16x1xf32>
    %151 = vector.broadcast %150 : vector<16x1xf32> to vector<16x32xf32>
    %152 = arith.mulf %147, %151 : vector<16x32xf32>
    %153 = vector.shape_cast %132 : vector<32xf32> to vector<1x32xf32>
    %154 = vector.broadcast %153 : vector<1x32xf32> to vector<16x32xf32>
    %155 = arith.mulf %152, %154 : vector<16x32xf32>
    %156 = vector.shape_cast %134 : vector<32xf32> to vector<1x32xf32>
    %157 = vector.broadcast %156 : vector<1x32xf32> to vector<16x32xf32>
    %158 = arith.addf %155, %157 : vector<16x32xf32>
    %159 = arith.addf %158, %4 : vector<16x32xf32>
    %160 = arith.truncf %159 : vector<16x32xf32> to vector<16x32xbf16>
    %c1 = arith.constant 1 : index
    %c0_52 = arith.constant 0 : index
    %c0_53 = arith.constant 0 : index
    %161 = vector.load %arg4[%c1, %c0_52, %c0_53] : memref<2x32x96xbf16, #tpu.memory_space<vmem>>, vector<1x32x96xbf16>
    %162 = vector.shape_cast %161 : vector<1x32x96xbf16> to vector<32x96xbf16>
    %cst_54 = arith.constant dense<0.000000e+00> : vector<16x96xf32>
    %163 = tpu.matmul %160, %162, %cst_54 {dimension_numbers = #tpu.dot_dimension_numbers<[1], [0], [0], [1], [0, 0, 1, 1], [], []>} : vector<16x32xbf16>, vector<32x96xbf16>, vector<16x96xf32> -> vector<16x96xf32>
    %c1_55 = arith.constant 1 : index
    %c0_56 = arith.constant 0 : index
    %164 = vector.load %arg5[%c1_55, %c0_56] : memref<2x96xf32, #tpu.memory_space<vmem>>, vector<1x96xf32>
    %165 = vector.shape_cast %164 : vector<1x96xf32> to vector<96xf32>
    %166 = vector.shape_cast %165 : vector<96xf32> to vector<1x96xf32>
    %167 = vector.broadcast %166 : vector<1x96xf32> to vector<16x96xf32>
    %168 = arith.addf %163, %167 : vector<16x96xf32>
    %169 = vector.extract_strided_slice %168 {offsets = [0, 0], sizes = [16, 8], strides = [1, 1]} : vector<16x96xf32> to vector<16x8xf32>
    %170 = vector.shape_cast %169 : vector<16x8xf32> to vector<2x8x8xf32>
    %171 = vector.extract_strided_slice %168 {offsets = [0, 8], sizes = [16, 8], strides = [1, 1]} : vector<16x96xf32> to vector<16x8xf32>
    %172 = vector.shape_cast %171 : vector<16x8xf32> to vector<2x8x8xf32>
    %173 = vector.extract_strided_slice %168 {offsets = [0, 16], sizes = [16, 8], strides = [1, 1]} : vector<16x96xf32> to vector<16x8xf32>
    %174 = vector.shape_cast %173 : vector<16x8xf32> to vector<2x8x8xf32>
    %175 = vector.extract_strided_slice %168 {offsets = [0, 24], sizes = [16, 8], strides = [1, 1]} : vector<16x96xf32> to vector<16x8xf32>
    %176 = vector.shape_cast %175 : vector<16x8xf32> to vector<2x8x8xf32>
    %177 = vector.extract_strided_slice %168 {offsets = [0, 32], sizes = [16, 8], strides = [1, 1]} : vector<16x96xf32> to vector<16x8xf32>
    %178 = vector.shape_cast %177 : vector<16x8xf32> to vector<2x8x8xf32>
    %179 = vector.extract_strided_slice %168 {offsets = [0, 40], sizes = [16, 8], strides = [1, 1]} : vector<16x96xf32> to vector<16x8xf32>
    %180 = vector.shape_cast %179 : vector<16x8xf32> to vector<2x8x8xf32>
    %181 = vector.extract_strided_slice %168 {offsets = [0, 48], sizes = [16, 8], strides = [1, 1]} : vector<16x96xf32> to vector<16x8xf32>
    %182 = vector.shape_cast %181 : vector<16x8xf32> to vector<2x8x8xf32>
    %183 = vector.extract_strided_slice %168 {offsets = [0, 56], sizes = [16, 8], strides = [1, 1]} : vector<16x96xf32> to vector<16x8xf32>
    %184 = vector.shape_cast %183 : vector<16x8xf32> to vector<2x8x8xf32>
    %185 = vector.extract_strided_slice %168 {offsets = [0, 64], sizes = [16, 8], strides = [1, 1]} : vector<16x96xf32> to vector<16x8xf32>
    %186 = vector.shape_cast %185 : vector<16x8xf32> to vector<2x8x8xf32>
    %187 = vector.extract_strided_slice %168 {offsets = [0, 72], sizes = [16, 8], strides = [1, 1]} : vector<16x96xf32> to vector<16x8xf32>
    %188 = vector.shape_cast %187 : vector<16x8xf32> to vector<2x8x8xf32>
    %189 = vector.extract_strided_slice %168 {offsets = [0, 80], sizes = [16, 8], strides = [1, 1]} : vector<16x96xf32> to vector<16x8xf32>
    %190 = vector.shape_cast %189 : vector<16x8xf32> to vector<2x8x8xf32>
    %191 = vector.extract_strided_slice %168 {offsets = [0, 88], sizes = [16, 8], strides = [1, 1]} : vector<16x96xf32> to vector<16x8xf32>
    %192 = vector.shape_cast %191 : vector<16x8xf32> to vector<2x8x8xf32>
    %193 = tpu.concatenate %170, %172, %174, %176, %178, %180, %182, %184, %186, %188, %190, %192 in 0 : vector<2x8x8xf32>, vector<2x8x8xf32>, vector<2x8x8xf32>, vector<2x8x8xf32>, vector<2x8x8xf32>, vector<2x8x8xf32>, vector<2x8x8xf32>, vector<2x8x8xf32>, vector<2x8x8xf32>, vector<2x8x8xf32>, vector<2x8x8xf32>, vector<2x8x8xf32> -> vector<24x8x8xf32>
    %194 = vector.extract_strided_slice %193 {offsets = [0, 0, 0], sizes = [8, 8, 8], strides = [1, 1, 1]} : vector<24x8x8xf32> to vector<8x8x8xf32>
    %195 = arith.truncf %194 : vector<8x8x8xf32> to vector<8x8x8xbf16>
    %196 = vector.extract_strided_slice %193 {offsets = [8, 0, 0], sizes = [8, 8, 8], strides = [1, 1, 1]} : vector<24x8x8xf32> to vector<8x8x8xf32>
    %197 = arith.truncf %196 : vector<8x8x8xf32> to vector<8x8x8xbf16>
    %198 = vector.extract_strided_slice %193 {offsets = [16, 0, 0], sizes = [8, 8, 8], strides = [1, 1, 1]} : vector<24x8x8xf32> to vector<8x8x8xf32>
    %199 = arith.truncf %198 : vector<8x8x8xf32> to vector<8x8x8xbf16>
    "tpu.trace_start"() <{level = 10 : i32, message = "bqd,bkd->bqk"}> : () -> ()
    %cst_57 = arith.constant dense<0.000000e+00> : vector<8x8x8xf32>
    %200 = tpu.matmul %195, %197, %cst_57 {dimension_numbers = #tpu.dot_dimension_numbers<[2], [2], [1], [1], [0, 0, 0, 1, 1, 1], [0], [0]>} : vector<8x8x8xbf16>, vector<8x8x8xbf16>, vector<8x8x8xf32> -> vector<8x8x8xf32>
    "tpu.trace_stop"() : () -> ()
    %201 = arith.addf %200, %18 : vector<8x8x8xf32>
    %cst_58 = arith.constant dense<0xFF800000> : vector<8x8xf32>
    %202 = vector.multi_reduction <maximumf>, %201, %cst_58 [2] : vector<8x8x8xf32> to vector<8x8xf32>
    %203 = vector.shape_cast %202 : vector<8x8xf32> to vector<8x8x1xf32>
    %204 = vector.broadcast %203 : vector<8x8x1xf32> to vector<8x8x8xf32>
    %205 = arith.subf %201, %204 : vector<8x8x8xf32>
    %206 = math.exp %205 : vector<8x8x8xf32>
    %cst_59 = arith.constant dense<0.000000e+00> : vector<8x8xf32>
    %207 = vector.multi_reduction <add>, %206, %cst_59 [2] : vector<8x8x8xf32> to vector<8x8xf32>
    %208 = vector.shape_cast %207 : vector<8x8xf32> to vector<8x8x1xf32>
    %209 = tpu.reciprocal %208 : vector<8x8x1xf32> -> vector<8x8x1xf32>
    %210 = vector.broadcast %209 : vector<8x8x1xf32> to vector<8x8x8xf32>
    %211 = arith.mulf %206, %210 : vector<8x8x8xf32>
    %212 = arith.truncf %211 : vector<8x8x8xf32> to vector<8x8x8xbf16>
    "tpu.trace_start"() <{level = 10 : i32, message = "bqk,bkd->bqd"}> : () -> ()
    %cst_60 = arith.constant dense<0.000000e+00> : vector<8x8x8xf32>
    %213 = tpu.matmul %212, %199, %cst_60 {dimension_numbers = #tpu.dot_dimension_numbers<[2], [1], [1], [2], [0, 0, 0, 1, 1, 2], [0], [0]>} : vector<8x8x8xbf16>, vector<8x8x8xbf16>, vector<8x8x8xf32> -> vector<8x8x8xf32>
    "tpu.trace_stop"() : () -> ()
    %214 = vector.shape_cast %213 : vector<8x8x8xf32> to vector<4x16x8xf32>
    %215 = arith.truncf %214 : vector<4x16x8xf32> to vector<4x16x8xbf16>
    %c1_61 = arith.constant 1 : index
    %c0_62 = arith.constant 0 : index
    %c0_63 = arith.constant 0 : index
    %c0_64 = arith.constant 0 : index
    %216 = vector.load %arg6[%c1_61, %c0_62, %c0_63, %c0_64] : memref<2x4x8x32xbf16, #tpu.memory_space<vmem>>, vector<1x4x8x32xbf16>
    %217 = vector.shape_cast %216 : vector<1x4x8x32xbf16> to vector<4x8x32xbf16>
    "tpu.trace_start"() <{level = 10 : i32, message = "hnd,hdk->hnk"}> : () -> ()
    %cst_65 = arith.constant dense<0.000000e+00> : vector<4x16x32xf32>
    %218 = tpu.matmul %215, %217, %cst_65 {dimension_numbers = #tpu.dot_dimension_numbers<[2], [1], [1], [2], [0, 0, 0, 1, 1, 2], [0], [0]>} : vector<4x16x8xbf16>, vector<4x8x32xbf16>, vector<4x16x32xf32> -> vector<4x16x32xf32>
    "tpu.trace_stop"() : () -> ()
    %cst_66 = arith.constant dense<0.000000e+00> : vector<16x32xf32>
    %219 = vector.multi_reduction <add>, %218, %cst_66 [0] : vector<4x16x32xf32> to vector<16x32xf32>
    %c1_67 = arith.constant 1 : index
    %c0_68 = arith.constant 0 : index
    %220 = vector.load %arg7[%c1_67, %c0_68] : memref<2x32xf32, #tpu.memory_space<vmem>>, vector<1x32xf32>
    %221 = vector.shape_cast %220 : vector<1x32xf32> to vector<32xf32>
    %222 = vector.shape_cast %221 : vector<32xf32> to vector<1x32xf32>
    %223 = vector.broadcast %222 : vector<1x32xf32> to vector<16x32xf32>
    %224 = arith.addf %219, %223 : vector<16x32xf32>
    %225 = arith.addf %159, %224 : vector<16x32xf32>
    %c1_69 = arith.constant 1 : index
    %c0_70 = arith.constant 0 : index
    %226 = vector.load %arg8[%c1_69, %c0_70] : memref<2x32xf32, #tpu.memory_space<vmem>>, vector<1x32xf32>
    %227 = vector.shape_cast %226 : vector<1x32xf32> to vector<32xf32>
    %c1_71 = arith.constant 1 : index
    %c0_72 = arith.constant 0 : index
    %228 = vector.load %arg9[%c1_71, %c0_72] : memref<2x32xf32, #tpu.memory_space<vmem>>, vector<1x32xf32>
    %229 = vector.shape_cast %228 : vector<1x32xf32> to vector<32xf32>
    %cst_73 = arith.constant dense<0.000000e+00> : vector<16xf32>
    %230 = vector.multi_reduction <add>, %225, %cst_73 [1] : vector<16x32xf32> to vector<16xf32>
    %231 = vector.shape_cast %230 : vector<16xf32> to vector<16x1xf32>
    %cst_74 = arith.constant 3.200000e+01 : f32
    %232 = vector.broadcast %cst_74 : f32 to vector<16x1xf32>
    %233 = arith.divf %231, %232 : vector<16x1xf32>
    %234 = vector.broadcast %233 : vector<16x1xf32> to vector<16x32xf32>
    %235 = arith.subf %225, %234 : vector<16x32xf32>
    %236 = arith.mulf %235, %235 : vector<16x32xf32>
    %cst_75 = arith.constant dense<0.000000e+00> : vector<16xf32>
    %237 = vector.multi_reduction <add>, %236, %cst_75 [1] : vector<16x32xf32> to vector<16xf32>
    %238 = vector.shape_cast %237 : vector<16xf32> to vector<16x1xf32>
    %cst_76 = arith.constant 3.200000e+01 : f32
    %239 = vector.broadcast %cst_76 : f32 to vector<16x1xf32>
    %240 = arith.divf %238, %239 : vector<16x1xf32>
    %241 = vector.broadcast %233 : vector<16x1xf32> to vector<16x32xf32>
    %242 = arith.subf %225, %241 : vector<16x32xf32>
    %cst_77 = arith.constant 9.99999974E-6 : f32
    %243 = vector.broadcast %cst_77 : f32 to vector<16x1xf32>
    %244 = arith.addf %240, %243 : vector<16x1xf32>
    %245 = math.rsqrt %244 : vector<16x1xf32>
    %246 = vector.broadcast %245 : vector<16x1xf32> to vector<16x32xf32>
    %247 = arith.mulf %242, %246 : vector<16x32xf32>
    %248 = vector.shape_cast %227 : vector<32xf32> to vector<1x32xf32>
    %249 = vector.broadcast %248 : vector<1x32xf32> to vector<16x32xf32>
    %250 = arith.mulf %247, %249 : vector<16x32xf32>
    %251 = vector.shape_cast %229 : vector<32xf32> to vector<1x32xf32>
    %252 = vector.broadcast %251 : vector<1x32xf32> to vector<16x32xf32>
    %253 = arith.addf %250, %252 : vector<16x32xf32>
    %254 = arith.truncf %253 : vector<16x32xf32> to vector<16x32xbf16>
    %c1_78 = arith.constant 1 : index
    %c0_79 = arith.constant 0 : index
    %c0_80 = arith.constant 0 : index
    %255 = vector.load %arg10[%c1_78, %c0_79, %c0_80] : memref<2x32x32xbf16, #tpu.memory_space<vmem>>, vector<1x32x32xbf16>
    %256 = vector.shape_cast %255 : vector<1x32x32xbf16> to vector<32x32xbf16>
    %cst_81 = arith.constant dense<0.000000e+00> : vector<16x32xf32>
    %257 = tpu.matmul %254, %256, %cst_81 {dimension_numbers = #tpu.dot_dimension_numbers<[1], [0], [0], [1], [0, 0, 1, 1], [], []>} : vector<16x32xbf16>, vector<32x32xbf16>, vector<16x32xf32> -> vector<16x32xf32>
    %c1_82 = arith.constant 1 : index
    %c0_83 = arith.constant 0 : index
    %258 = vector.load %arg11[%c1_82, %c0_83] : memref<2x32xf32, #tpu.memory_space<vmem>>, vector<1x32xf32>
    %259 = vector.shape_cast %258 : vector<1x32xf32> to vector<32xf32>
    %260 = vector.shape_cast %259 : vector<32xf32> to vector<1x32xf32>
    %261 = vector.broadcast %260 : vector<1x32xf32> to vector<16x32xf32>
    %262 = arith.addf %257, %261 : vector<16x32xf32>
    %cst_84 = arith.constant 0.000000e+00 : f32
    %263 = vector.broadcast %cst_84 : f32 to vector<16x32xf32>
    %264 = arith.maximumf %262, %263 : vector<16x32xf32>
    %265 = arith.addf %253, %264 : vector<16x32xf32>
    %c1_85 = arith.constant 1 : index
    %c0_86 = arith.constant 0 : index
    %266 = vector.load %arg12[%c1_85, %c0_86] : memref<2x32xf32, #tpu.memory_space<vmem>>, vector<1x32xf32>
    %267 = vector.shape_cast %266 : vector<1x32xf32> to vector<32xf32>
    %c1_87 = arith.constant 1 : index
    %c0_88 = arith.constant 0 : index
    %268 = vector.load %arg13[%c1_87, %c0_88] : memref<2x32xf32, #tpu.memory_space<vmem>>, vector<1x32xf32>
    %269 = vector.shape_cast %268 : vector<1x32xf32> to vector<32xf32>
    %cst_89 = arith.constant dense<0.000000e+00> : vector<16xf32>
    %270 = vector.multi_reduction <add>, %265, %cst_89 [1] : vector<16x32xf32> to vector<16xf32>
    %271 = vector.shape_cast %270 : vector<16xf32> to vector<16x1xf32>
    %cst_90 = arith.constant 3.200000e+01 : f32
    %272 = vector.broadcast %cst_90 : f32 to vector<16x1xf32>
    %273 = arith.divf %271, %272 : vector<16x1xf32>
    %274 = vector.broadcast %273 : vector<16x1xf32> to vector<16x32xf32>
    %275 = arith.subf %265, %274 : vector<16x32xf32>
    %276 = arith.mulf %275, %275 : vector<16x32xf32>
    %cst_91 = arith.constant dense<0.000000e+00> : vector<16xf32>
    %277 = vector.multi_reduction <add>, %276, %cst_91 [1] : vector<16x32xf32> to vector<16xf32>
    %278 = vector.shape_cast %277 : vector<16xf32> to vector<16x1xf32>
    %cst_92 = arith.constant 3.200000e+01 : f32
    %279 = vector.broadcast %cst_92 : f32 to vector<16x1xf32>
    %280 = arith.divf %278, %279 : vector<16x1xf32>
    %281 = vector.broadcast %273 : vector<16x1xf32> to vector<16x32xf32>
    %282 = arith.subf %265, %281 : vector<16x32xf32>
    %cst_93 = arith.constant 9.99999974E-6 : f32
    %283 = vector.broadcast %cst_93 : f32 to vector<16x1xf32>
    %284 = arith.addf %280, %283 : vector<16x1xf32>
    %285 = math.rsqrt %284 : vector<16x1xf32>
    %286 = vector.broadcast %285 : vector<16x1xf32> to vector<16x32xf32>
    %287 = arith.mulf %282, %286 : vector<16x32xf32>
    %288 = vector.shape_cast %267 : vector<32xf32> to vector<1x32xf32>
    %289 = vector.broadcast %288 : vector<1x32xf32> to vector<16x32xf32>
    %290 = arith.mulf %287, %289 : vector<16x32xf32>
    %291 = vector.shape_cast %269 : vector<32xf32> to vector<1x32xf32>
    %292 = vector.broadcast %291 : vector<1x32xf32> to vector<16x32xf32>
    %293 = arith.addf %290, %292 : vector<16x32xf32>
    %294 = arith.truncf %293 : vector<16x32xf32> to vector<16x32xbf16>
    %c0_94 = arith.constant 0 : index
    %c0_95 = arith.constant 0 : index
    %295 = vector.load %arg14[%c0_94, %c0_95] : memref<32x128xbf16, #tpu.memory_space<vmem>>, vector<32x128xbf16>
    %cst_96 = arith.constant dense<0.000000e+00> : vector<16x128xf32>
    %296 = tpu.matmul %294, %295, %cst_96 {dimension_numbers = #tpu.dot_dimension_numbers<[1], [0], [0], [1], [0, 0, 1, 1], [], []>} : vector<16x32xbf16>, vector<32x128xbf16>, vector<16x128xf32> -> vector<16x128xf32>
    %c0_97 = arith.constant 0 : index
    %c0_98 = arith.constant 0 : index
    %297 = vector.load %arg15[%c0_97, %c0_98] : memref<1x128xf32, #tpu.memory_space<vmem>>, vector<1x128xf32>
    %298 = vector.broadcast %297 : vector<1x128xf32> to vector<16x128xf32>
    %299 = arith.addf %296, %298 : vector<16x128xf32>
    %c0_99 = arith.constant 0 : index
    %c0_100 = arith.constant 0 : index
    %300 = vector.load %arg16[%c0_99, %c0_100] : memref<16x128xf32, #tpu.memory_space<vmem>>, vector<16x128xf32>
    tpu.vector_store %arg16[%c0_99, %c0_100], %299 {strides = array<i32>} : memref<16x128xf32, #tpu.memory_space<vmem>>, vector<16x128xf32>,
    return
  }
}

</mosaic_0001>

<bundles_post_ra>
// kernel: simple_transformer_forward.1
= control target key start
LH: loop header
LB: loop body
LE: loop exit
PB: predicated region body
PF: predicated region fallthrough
CT: control target
= control target key end

     0   :  { %v3604_v0 = vmov 0.0   ;;  %vm3605_vm0 = vmmov 0   ;;  %vm73_vm1 = vcmask 130048   ;;  %vm142_vm2 = vcmask 261120   ;;  %s3606_s21 = smov 120   ;;  %s3607_s22 = smov 96   ;;  %s4256_s3 = inlined_call_operand.vmem [shape: bf16[16,32], index: 3, kind: input, shape index: {}]   ;;  %s4257_s0 = inlined_call_operand.vmem [shape: f32[16,16], index: 0, kind: input, shape index: {}]   ;;  %s4258_s4 = inlined_call_operand.vmem [shape: bf16[2,32,96], index: 4, kind: input, shape index: {}]   ;;  %s4259_s2 = inlined_call_operand.vmem [shape: f32[8,32], index: 2, kind: input, shape index: {}]   ;;  %s4260_s1 = inlined_call_operand.vmem [shape: f32[8,32], index: 1, kind: input, shape index: {}]   ;;  %s4261_s5 = inlined_call_operand.vmem [shape: f32[2,96], index: 5, kind: input, shape index: {}]   ;;  %s4262_s6 = inlined_call_operand.vmem [shape: bf16[2,4,8,32], index: 6, kind: input, shape index: {}]   ;;  %s4263_s7 = inlined_call_operand.vmem [shape: f32[2,32], index: 7, kind: input, shape index: {}]   ;;  %s4264_s10 = inlined_call_operand.vmem [shape: bf16[2,32,32], index: 10, kind: input, shape index: {}]   ;;  %s4265_s8 = inlined_call_operand.vmem [shape: f32[2,32], index: 8, kind: input, shape index: {}]   ;;  %s4266_s9 = inlined_call_operand.vmem [shape: f32[2,32], index: 9, kind: input, shape index: {}]   ;;  %s4267_s11 = inlined_call_operand.vmem [shape: f32[2,32], index: 11, kind: input, shape index: {}]   ;;  %s4268_s12 = inlined_call_operand.vmem [shape: f32[2,32], index: 12, kind: input, shape index: {}]   ;;  %s4269_s13 = inlined_call_operand.vmem [shape: f32[2,32], index: 13, kind: input, shape index: {}]   ;;  %s4270_s14 = inlined_call_operand.vmem [shape: bf16[32,128], index: 14, kind: input, shape index: {}]   ;;  %s4271_s15 = inlined_call_operand.vmem [shape: f32[1,128], index: 15, kind: input, shape index: {}]   ;;  %s4272_s16 = inlined_call_operand.vmem [shape: f32[16,128], index: 16, kind: output, shape index: {}]  }
   0x1   :  { %4273 = sst [smem:[#allocation2_spill]] %s4256_s3  ;;  %3102 = vmatprep.subr.bf16.mxu0 %v3604_v0  ;;  %3104 = vmatprep.mubr.msk.bf16.mxu0 %vm3605_vm0, %v3604_v0  ;;  %v62_v2 = vld [vmem:[%s4257_s0] sm:$0xff]  ;;  %v63_v3 = vld [vmem:[%s4257_s0 + $0x8] sm:$0xff]  ;;  %s3609_s24 = smov 88   ;;  %vm279_vm3 = vcmask 64512   ;;  %vm747_vm5 = vcmask 1043456  }
   0x2   :  { %s4274_s23 = sld [smem:[#allocation2_spill]]  ;;  %3108 = vmatprep.subr.bf16.mxu1 %v3604_v0  ;;  %3112 = vmatprep.mubr.msk.bf16.mxu1 %vm3605_vm0, %v3604_v0  ;;  %v64_v4 = vpack.c.bf16 %v63_v3, %v62_v2  ;;  %v3513_v5 = vld [vmem:[%s4258_s4] sm:$0xff]   ;;  %v3514_v6 = vld [vmem:[%s4258_s4 + $0x8] sm:$0xff]   ;;  %s3610_s25 = smov 72  }
   0x3   :  { %3109 = vmatpush3.bf16.msra.mxu1 %v3513_v5  ;;  %v55_v7 = vld [vmem:[%s4259_s2] sm:$0xff]  ;;  %s3611_s26 = smov 112   ;;  %s3612_s27 = smov 104  }
   0x4   :  { %3110 = vmatprep.subr.bf16.mxu1 %v3604_v0  ;;  %v54_v11 = vld [vmem:[%s4260_s1] sm:$0xff]  ;;  %s3614_s28 = smov 64   ;;  %s3615_s29 = smov 48  }
   0x5   :  { %v2923_v18 = vld [vmem:[%s4261_s5] ss:$0 sm:$0xff]  ;;  %s3616_s0 = smov 40   ;;  %s3617_s30 = smov 56  }
   0x7   :  { %3111 = vmatpush3.bf16.msra.mxu1 %v3514_v6 }
   0x8   :  { %v3512_v1 = vld [vmem:[%s4274_s23] sm:$0xff]   ;;  %3122 = vmatprep.subr.bf16.mxu1 %v3604_v0  ;;  %s3608_s23 = smov 80  }
   0x9   :  { %3103 = vmatpush3.bf16.msra.mxu0 %v3512_v1 }
   0xa   :  { %3116 = vmatprep.subr.bf16.mxu0 %v3604_v0 }
   0xc   :  { %3105 = vmatmul.mubr.msk.bf16.vlgmr.msra.gmra.mrb[0].mxu0 %vm73_vm1, %v64_v4 }
   0xd   :  { %3118 = vmatprep.mubr.msk.bf16.mxu0 %vm3605_vm0, %v3604_v0 }
  0xdf   :  { %v111_v8 = vpop.f32.mrb[0].mxu0 }
  0xe0   :  { %v112_v9 = vadd.f32 %v111_v8, %v55_v7  ;;  %v3106_v10 = vpop.f32.mrb[1].mxu0  ;;  %v56_v8 = vlaneseq }
  0xe1   :  { %v114_v12 = vpop.f32.mrb[2].mxu0 }
  0xe2   :  { %v115_v13 = vadd.f32 %v114_v12, %v55_v7  ;;  %v3107_v14 = vpop.f32.mrb[3].mxu0  ;;  %v3735_v15 = vadd.f32 %v112_v9, %v54_v11  ;;  %v57_v9 = vshrl.u32 %v56_v8, 7  ;;  %v59_v10 = vand.u32 127, %v56_v8 }
  0xe4   :  { %v3737_v16 = vadd.f32 %v115_v13, %v54_v11  ;;  %vm60_vm4 = vcmp.le.s32.totalorder %v59_v10, %v57_v9  ;;  %v3613_v11 = vmov -1e+30  }
  0xe5   :  { %v3803_v12 = vsel %vm60_vm4, 0.0, %v3613_v11 }
  0xe6   :  { %v120_v17 = vpack.c.bf16 %v3737_v16, %v3735_v15 }
  0xe8   :  { %3113 = vmatmul.mubr.msk.bf16.vlgmr.msra.gmra.mrb[0].mxu1 %vm142_vm2, %v120_v17 }
  0xe9   :  { %3124 = vmatprep.mubr.msk.bf16.mxu1 %vm3605_vm0, %v3604_v0 }
 0x1bb   :  { %v180_v19 = vpop.f32.mrb[0].mxu1 }
 0x1bc   :  { %v3114_v20 = vpop.f32.mrb[1].mxu1  ;;  %v181_v22 = vadd.f32 %v2923_v18, %v180_v19 }
 0x1bd   :  { %v183_v21 = vpop.f32.mrb[2].mxu1 }
 0x1be   :  { %v184_v23 = vadd.f32 %v2923_v18, %v183_v21  ;;  %v3115_v24 = vpop.f32.mrb[3].mxu1  ;;  %v255_v40 = vpack.c.bf16 %v181_v22, %v181_v22 }
 0x1c0   :  { %v3747_v25 = vpack.i.bf16 %v184_v23, %v181_v22  ;;  %v256_v41 = vpack.c.bf16 %v184_v23, %v184_v23 }
 0x1c2   :  { %3413 = vrot.lane.b32.xlu1 %v3747_v25, %s3606_s21  ;;  %3403 = vrot.lane.b32.xlu0 %v3747_v25, %s3607_s22 }
 0x1c6   :  { %3418 = vrot.lane.b32.xlu1 %v3747_v25, %s3608_s23  ;;  %3408 = vrot.lane.b32.xlu0 %v3747_v25, %s3609_s24 }
 0x1ca   :  { %3428 = vrot.lane.b32.xlu1 %v3747_v25, %s3610_s25  ;;  %3423 = vrot.lane.b32.xlu0 %v3747_v25, %s3611_s26 }
 0x1ce   :  { %3433 = vrot.lane.b32.xlu0 %v3747_v25, %s3612_s27 }
 0x234   :  { %v3404_v26 = vpop.permute.xlu0 %3403  ;;  %v3414_v32 = vpop.permute.xlu1 %3413 }
 0x235   :  { %v3406_v27 = vunpack.i.h.bf16 %v3404_v26  ;;  %v3405_v28 = vunpack.i.l.bf16 %v3404_v26  ;;  %v3415_v46 = vunpack.i.l.bf16 %v3414_v32  ;;  %v3416_v47 = vunpack.i.h.bf16 %v3414_v32 }
 0x237   :  { %v264_v29 = vpack.c.bf16 %v3406_v27, %v3406_v27  ;;  %v263_v30 = vpack.c.bf16 %v3405_v28, %v3405_v28  ;;  %v257_v51 = vpack.c.bf16 %v3415_v46, %v3415_v46  ;;  %v258_v52 = vpack.c.bf16 %v3416_v47, %v3416_v47 }
 0x238   :  { %v3409_v31 = vpop.permute.xlu0 %3408  ;;  %v3419_v38 = vpop.permute.xlu1 %3418 }
 0x239   :  { %v3410_v33 = vunpack.i.l.bf16 %v3409_v31  ;;  %v284_v34 = vsel %vm279_vm3, %v263_v30, 0  ;;  %v330_v35 = vsel %vm279_vm3, %v264_v29, 0  ;;  %v3411_v36 = vunpack.i.h.bf16 %v3409_v31 }
 0x23a   :  { %3117 = vmatpush3.bf16.xpose.msra.mxu0 %v284_v34  ;;  %3123 = vmatpush3.bf16.xpose.msra.mxu1 %v330_v35  ;;  %v3420_v42 = vunpack.i.l.bf16 %v3419_v38  ;;  %v3421_v44 = vunpack.i.h.bf16 %v3419_v38 }
 0x23b   :  { %3128 = vmatprep.subr.bf16.mxu0 %v3604_v0  ;;  %3134 = vmatprep.subr.bf16.mxu1 %v3604_v0  ;;  %v265_v37 = vpack.c.bf16 %v3410_v33, %v3410_v33  ;;  %v266_v39 = vpack.c.bf16 %v3411_v36, %v3411_v36 }
 0x23c   :  { %v267_v48 = vpack.c.bf16 %v3420_v42, %v3420_v42  ;;  %v268_v49 = vpack.c.bf16 %v3421_v44, %v3421_v44  ;;  %v3429_v50 = vpop.permute.xlu1 %3428  ;;  %v3424_v53 = vpop.permute.xlu0 %3423 }
 0x23d   :  { %v376_v43 = vsel %vm279_vm3, %v265_v37, 0  ;;  %v422_v45 = vsel %vm279_vm3, %v266_v39, 0  ;;  %v3430_v54 = vunpack.i.l.bf16 %v3429_v50  ;;  %v3431_v56 = vunpack.i.h.bf16 %v3429_v50 }
 0x23e   :  { %v468_v55 = vsel %vm279_vm3, %v267_v48, 0  ;;  %v514_v57 = vsel %vm279_vm3, %v268_v49, 0  ;;  %v3425_v58 = vunpack.i.l.bf16 %v3424_v53  ;;  %v3426_v59 = vunpack.i.h.bf16 %v3424_v53 }
 0x23f   :  { %v269_v60 = vpack.c.bf16 %v3430_v54, %v3430_v54  ;;  %v270_v61 = vpack.c.bf16 %v3431_v56, %v3431_v56 }
 0x240   :  { %v259_v62 = vpack.c.bf16 %v3425_v58, %v3425_v58  ;;  %v260_v63 = vpack.c.bf16 %v3426_v59, %v3426_v59  ;;  %v3434_v1 = vpop.permute.xlu0 %3433 }
 0x241   :  { %3119 = vmatmul.mubr.msk.bf16.vlgmr.msra.gmra.mrb[4].mxu0 %vm279_vm3, %v255_v40  ;;  %3125 = vmatmul.mubr.msk.bf16.vlgmr.msra.gmra.mrb[4].mxu1 %vm279_vm3, %v256_v41  ;;  %v560_v2 = vsel %vm279_vm3, %v269_v60, 0  ;;  %v606_v3 = vsel %vm279_vm3, %v270_v61, 0  ;;  %v3435_v4 = vunpack.i.l.bf16 %v3434_v1  ;;  %v3436_v5 = vunpack.i.h.bf16 %v3434_v1 }
 0x242   :  { %3129 = vmatpush3.bf16.xpose.msra.mxu0 %v376_v43  ;;  %3135 = vmatpush3.bf16.xpose.msra.mxu1 %v422_v45 }
 0x243   :  { %3130 = vmatprep.mubr.msk.bf16.mxu0 %vm3605_vm0, %v3604_v0  ;;  %3136 = vmatprep.mubr.msk.bf16.mxu1 %vm3605_vm0, %v3604_v0  ;;  %v261_v6 = vpack.c.bf16 %v3435_v4, %v3435_v4  ;;  %v262_v7 = vpack.c.bf16 %v3436_v5, %v3436_v5 }
 0x244   :  { %3140 = vmatprep.subr.bf16.mxu0 %v3604_v0  ;;  %3146 = vmatprep.subr.bf16.mxu1 %v3604_v0 }
 0x249   :  { %3131 = vmatmul.mubr.msk.bf16.vlgmr.msra.gmra.mrb[8].mxu0 %vm279_vm3, %v257_v51  ;;  %3137 = vmatmul.mubr.msk.bf16.vlgmr.msra.gmra.mrb[8].mxu1 %vm279_vm3, %v258_v52 }
 0x24a   :  { %3141 = vmatpush3.bf16.xpose.msra.mxu0 %v468_v55  ;;  %3147 = vmatpush3.bf16.xpose.msra.mxu1 %v514_v57 }
 0x24b   :  { %3142 = vmatprep.mubr.msk.bf16.mxu0 %vm3605_vm0, %v3604_v0  ;;  %3148 = vmatprep.mubr.msk.bf16.mxu1 %vm3605_vm0, %v3604_v0 }
 0x24c   :  { %3152 = vmatprep.subr.bf16.mxu0 %v3604_v0  ;;  %3158 = vmatprep.subr.bf16.mxu1 %v3604_v0 }
 0x251   :  { %3143 = vmatmul.mubr.msk.bf16.vlgmr.msra.gmra.mrb[12].mxu0 %vm279_vm3, %v259_v62  ;;  %3149 = vmatmul.mubr.msk.bf16.vlgmr.msra.gmra.mrb[12].mxu1 %vm279_vm3, %v260_v63 }
 0x252   :  { %3153 = vmatpush3.bf16.xpose.msra.mxu0 %v560_v2  ;;  %3159 = vmatpush3.bf16.xpose.msra.mxu1 %v606_v3 }
 0x253   :  { %3154 = vmatprep.mubr.msk.bf16.mxu0 %vm3605_vm0, %v3604_v0  ;;  %3160 = vmatprep.mubr.msk.bf16.mxu1 %vm3605_vm0, %v3604_v0 }
 0x254   :  { %3164 = vmatprep.subr.bf16.mxu0 %v3604_v0  ;;  %3170 = vmatprep.subr.bf16.mxu1 %v3604_v0 }
 0x259   :  { %3155 = vmatmul.mubr.msk.bf16.vlgmr.msra.gmra.mrb[16].mxu0 %vm279_vm3, %v261_v6  ;;  %3161 = vmatmul.mubr.msk.bf16.vlgmr.msra.gmra.mrb[16].mxu1 %vm279_vm3, %v262_v7 }
 0x25a   :  { %3166 = vmatprep.mubr.msk.bf16.mxu0 %vm3605_vm0, %v3604_v0  ;;  %3172 = vmatprep.mubr.msk.bf16.mxu1 %vm3605_vm0, %v3604_v0 }
 0x314   :  { %v320_v13 = vpop.f32.mrb[4].mxu0  ;;  %v366_v17 = vpop.f32.mrb[4].mxu1 }
 0x315   :  { %v321_v14 = vadd.f32 %v320_v13, %v3803_v12  ;;  %v3120_v18 = vpop.f32.mrb[5].mxu0  ;;  %v367_v19 = vadd.f32 %v366_v17, %v3803_v12  ;;  %v3126_v20 = vpop.f32.mrb[5].mxu1 }
 0x316   :  { %v323_v21 = vpop.f32.mrb[6].mxu0  ;;  %v369_v22 = vpop.f32.mrb[6].mxu1 }
 0x317   :  { %v3121_v23 = vpop.f32.mrb[7].mxu0  ;;  %v648_v24 = vsel %vm279_vm3, %v321_v14, -inf  ;;  %v3127_v26 = vpop.f32.mrb[7].mxu1  ;;  %v651_v27 = vsel %vm279_vm3, %v367_v19, -inf }
 0x318   :  { %649 = vmax.xlane.f32.xlu1 %v648_v24  ;;  %652 = vmax.xlane.f32.xlu0 %v651_v27 }
 0x31c   :  { %v412_v28 = vpop.f32.mrb[8].mxu0  ;;  %v458_v30 = vpop.f32.mrb[8].mxu1 }
 0x31d   :  { %v413_v29 = vadd.f32 %v412_v28, %v3803_v12  ;;  %v3132_v31 = vpop.f32.mrb[9].mxu0  ;;  %v459_v32 = vadd.f32 %v458_v30, %v3803_v12  ;;  %v3138_v33 = vpop.f32.mrb[9].mxu1 }
 0x31e   :  { %v415_v34 = vpop.f32.mrb[10].mxu0  ;;  %v461_v35 = vpop.f32.mrb[10].mxu1 }
 0x31f   :  { %v3133_v36 = vpop.f32.mrb[11].mxu0  ;;  %v654_v37 = vsel %vm279_vm3, %v413_v29, -inf  ;;  %v3139_v38 = vpop.f32.mrb[11].mxu1  ;;  %v657_v39 = vsel %vm279_vm3, %v459_v32, -inf }
 0x320   :  { %655 = vmax.xlane.f32.xlu0 %v654_v37  ;;  %658 = vmax.xlane.f32.xlu1 %v657_v39 }
 0x324   :  { %v504_v40 = vpop.f32.mrb[12].mxu0  ;;  %v550_v42 = vpop.f32.mrb[12].mxu1 }
 0x325   :  { %v505_v41 = vadd.f32 %v504_v40, %v3803_v12  ;;  %v3144_v43 = vpop.f32.mrb[13].mxu0  ;;  %v551_v44 = vadd.f32 %v550_v42, %v3803_v12  ;;  %v3150_v45 = vpop.f32.mrb[13].mxu1 }
 0x326   :  { %v507_v46 = vpop.f32.mrb[14].mxu0  ;;  %v553_v47 = vpop.f32.mrb[14].mxu1 }
 0x327   :  { %v3145_v48 = vpop.f32.mrb[15].mxu0  ;;  %v660_v49 = vsel %vm279_vm3, %v505_v41, -inf  ;;  %v3151_v50 = vpop.f32.mrb[15].mxu1  ;;  %v663_v51 = vsel %vm279_vm3, %v551_v44, -inf }
 0x328   :  { %661 = vmax.xlane.f32.xlu0 %v660_v49  ;;  %664 = vmax.xlane.f32.xlu1 %v663_v51 }
 0x32c   :  { %v596_v52 = vpop.f32.mrb[16].mxu0  ;;  %v642_v54 = vpop.f32.mrb[16].mxu1 }
 0x32d   :  { %v597_v53 = vadd.f32 %v596_v52, %v3803_v12  ;;  %v3156_v55 = vpop.f32.mrb[17].mxu0  ;;  %v643_v56 = vadd.f32 %v642_v54, %v3803_v12  ;;  %v3162_v57 = vpop.f32.mrb[17].mxu1 }
 0x32e   :  { %v599_v58 = vpop.f32.mrb[18].mxu0  ;;  %v645_v59 = vpop.f32.mrb[18].mxu1 }
 0x32f   :  { %v3157_v60 = vpop.f32.mrb[19].mxu0  ;;  %v666_v61 = vsel %vm279_vm3, %v597_v53, -inf  ;;  %v3163_v62 = vpop.f32.mrb[19].mxu1  ;;  %v669_v63 = vsel %vm279_vm3, %v643_v56, -inf }
 0x330   :  { %667 = vmax.xlane.f32.xlu0 %v666_v61  ;;  %670 = vmax.xlane.f32.xlu1 %v669_v63 }
 0x346   :  { %3438 = vrot.lane.b32.xlu0 %v3747_v25, %s3614_s28 }
 0x3a5   :  { %v650_v1 = vpop.xlane.xlu1 %649  ;;  %v653_v2 = vpop.xlane.xlu0 %652 }
 0x3a6   :  { %v672_v3 = vsub.f32 %v321_v14, %v650_v1  ;;  %v673_v4 = vsub.f32 %v367_v19, %v653_v2 }
 0x3a8   :  { %v680_v5 = vmul.f32 1.442695, %v672_v3  ;;  %v682_v6 = vmul.f32 1.442695, %v673_v4 }
 0x3aa   :  { %3523 = vpow2.f32 %v680_v5 }
 0x3ab   :  { %3525 = vpow2.f32 %v682_v6 }
 0x3ad   :  { %v656_v7 = vpop.xlane.xlu0 %655  ;;  %v659_v8 = vpop.xlane.xlu1 %658 }
 0x3ae   :  { %v674_v9 = vsub.f32 %v413_v29, %v656_v7  ;;  %v675_v10 = vsub.f32 %v459_v32, %v659_v8 }
 0x3b0   :  { %v684_v11 = vmul.f32 1.442695, %v674_v9  ;;  %v686_v13 = vmul.f32 1.442695, %v675_v10 }
 0x3b2   :  { %3527 = vpow2.f32 %v684_v11 }
 0x3b3   :  { %3529 = vpow2.f32 %v686_v13 }
 0x3b4   :  { %v3823_v17 = vpop.eup %3523 }
 0x3b5   :  { %v3825_v18 = vpop.eup %3525  ;;  %v662_v20 = vpop.xlane.xlu0 %661  ;;  %v696_v14 = vsel %vm279_vm3, %v3823_v17, 0.0 }
 0x3b6   :  { %v665_v19 = vpop.xlane.xlu1 %664  ;;  %v676_v21 = vsub.f32 %v505_v41, %v662_v20  ;;  %v699_v22 = vsel %vm279_vm3, %v3825_v18, 0.0  ;;  %697 = vadd.xlane.f32.xlu0 %v696_v14 }
 0x3b7   :  { %v677_v23 = vsub.f32 %v551_v44, %v665_v19  ;;  %700 = vadd.xlane.f32.xlu1 %v699_v22 }
 0x3b8   :  { %v688_v24 = vmul.f32 1.442695, %v676_v21 }
 0x3b9   :  { %v690_v26 = vmul.f32 1.442695, %v677_v23 }
 0x3ba   :  { %3531 = vpow2.f32 %v688_v24 }
 0x3bb   :  { %3533 = vpow2.f32 %v690_v26 }
 0x3bc   :  { %v3831_v27 = vpop.eup %3527 }
 0x3bd   :  { %v3833_v28 = vpop.eup %3529  ;;  %v668_v29 = vpop.xlane.xlu0 %667  ;;  %v702_v30 = vsel %vm279_vm3, %v3831_v27, 0.0 }
 0x3be   :  { %v671_v31 = vpop.xlane.xlu1 %670  ;;  %v678_v32 = vsub.f32 %v597_v53, %v668_v29  ;;  %v705_v33 = vsel %vm279_vm3, %v3833_v28, 0.0  ;;  %703 = vadd.xlane.f32.xlu0 %v702_v30 }
 0x3bf   :  { %v679_v34 = vsub.f32 %v643_v56, %v671_v31  ;;  %706 = vadd.xlane.f32.xlu1 %v705_v33 }
 0x3c0   :  { %v692_v35 = vmul.f32 1.442695, %v678_v32 }
 0x3c1   :  { %v694_v36 = vmul.f32 1.442695, %v679_v34  ;;  %v3439_v37 = vpop.permute.xlu0 %3438 }
 0x3c2   :  { %3535 = vpow2.f32 %v692_v35  ;;  %v3441_v38 = vunpack.i.h.bf16 %v3439_v37  ;;  %v3440_v39 = vunpack.i.l.bf16 %v3439_v37 }
 0x3c3   :  { %3537 = vpow2.f32 %v694_v36 }
 0x3c4   :  { %v3839_v40 = vpop.eup %3531  ;;  %v272_v41 = vpack.c.bf16 %v3441_v38, %v3441_v38  ;;  %v271_v42 = vpack.c.bf16 %v3440_v39, %v3440_v39 }
 0x3c5   :  { %v3841_v43 = vpop.eup %3533  ;;  %v708_v44 = vsel %vm279_vm3, %v3839_v40, 0.0 }
 0x3c6   :  { %v711_v45 = vsel %vm279_vm3, %v3841_v43, 0.0  ;;  %709 = vadd.xlane.f32.xlu0 %v708_v44  ;;  %v749_v46 = vsel %vm747_vm5, %v271_v42, 0  ;;  %v795_v47 = vsel %vm747_vm5, %v272_v41, 0 }
 0x3c7   :  { %712 = vadd.xlane.f32.xlu1 %v711_v45  ;;  %3165 = vmatpush3.bf16.msra.mxu0 %v749_v46  ;;  %v1117_v45 = vld [vmem:[%s4262_s6] sm:$0xf] }
 0x3c8   :  { %3171 = vmatpush3.bf16.msra.mxu1 %v795_v47  ;;  %3176 = vmatprep.subr.bf16.mxu0 %v3604_v0  ;;  %v1125_v46 = vsel %vm747_vm5, %v1117_v45, 0  ;;  %v1118_v47 = vld [vmem:[%s4262_s6 + $0x4] sm:$0xf] }
 0x3c9   :  { %3182 = vmatprep.subr.bf16.mxu1 %v3604_v0 }
 0x3cc   :  { %v3851_v48 = vpop.eup %3535 }
 0x3cd   :  { %v714_v49 = vsel %vm279_vm3, %v3851_v48, 0.0  ;;  %v3855_v50 = vpop.eup %3537 }
 0x3ce   :  { %715 = vadd.xlane.f32.xlu1 %v714_v49  ;;  %v717_v51 = vsel %vm279_vm3, %v3855_v50, 0.0  ;;  %v1119_v49 = vld [vmem:[%s4262_s6 + $0x8] sm:$0xf] }
 0x3d2   :  { %718 = vadd.xlane.f32.xlu1 %v717_v51 }
 0x3dc   :  { %3448 = vrot.lane.b32.xlu0 %v3747_v25, %s3615_s29 }
 0x3e0   :  { %3453 = vrot.lane.b32.xlu0 %v3747_v25, %s3616_s0 }
 0x3e3   :  { %3443 = vrot.lane.b32.xlu1 %v3747_v25, %s3617_s30 }
 0x443   :  { %v698_v52 = vpop.xlane.xlu0 %697 }
 0x444   :  { %v701_v53 = vpop.xlane.xlu1 %700  ;;  %3539 = vrcp.f32 %v698_v52 }
 0x445   :  { %3541 = vrcp.f32 %v701_v53 }
 0x44b   :  { %v704_v25 = vpop.xlane.xlu0 %703 }
 0x44c   :  { %v707_v60 = vpop.xlane.xlu1 %706  ;;  %3543 = vrcp.f32 %v704_v25 }
 0x44d   :  { %3545 = vrcp.f32 %v707_v60  ;;  %v1120_v60 = vld [vmem:[%s4262_s6 + $0xc] sm:$0xf] }
 0x44e   :  { %v3540_v54 = vpop.eup %3539 }
 0x44f   :  { %v3542_v55 = vpop.eup %3541  ;;  %v728_v56 = vmul.f32 %v3540_v54, %v3823_v17 }
 0x450   :  { %v729_v57 = vmul.f32 %v3542_v55, %v3825_v18 }
 0x451   :  { %v736_v58 = vpack.c.bf16 %v728_v56, %v728_v56  ;;  %v1219_v56 = vsel %vm747_vm5, %v1119_v49, 0 }
 0x452   :  { %v737_v59 = vpack.c.bf16 %v729_v57, %v729_v57 }
 0x453   :  { %3167 = vmatmul.mubr.msk.bf16.vlgmr.msra.gmra.mrb[20].mxu0 %vm279_vm3, %v736_v58  ;;  %v710_v62 = vpop.xlane.xlu0 %709 }
 0x454   :  { %3173 = vmatmul.mubr.msk.bf16.vlgmr.msra.gmra.mrb[20].mxu1 %vm279_vm3, %v737_v59  ;;  %3178 = vmatprep.mubr.msk.bf16.mxu0 %vm3605_vm0, %v3604_v0  ;;  %v713_v61 = vpop.xlane.xlu1 %712  ;;  %3547 = vrcp.f32 %v710_v62 }
 0x455   :  { %3184 = vmatprep.mubr.msk.bf16.mxu1 %vm3605_vm0, %v3604_v0  ;;  %3549 = vrcp.f32 %v713_v61 }
 0x456   :  { %v3544_v3 = vpop.eup %3543 }
 0x457   :  { %v3449_v2 = vpop.permute.xlu0 %3448  ;;  %v3546_v4 = vpop.eup %3545  ;;  %v730_v11 = vmul.f32 %v3544_v3, %v3831_v27 }
 0x458   :  { %v3451_v5 = vunpack.i.h.bf16 %v3449_v2  ;;  %v3450_v7 = vunpack.i.l.bf16 %v3449_v2  ;;  %v731_v10 = vmul.f32 %v3546_v4, %v3833_v28  ;;  %v1266_v2 = vsel %vm747_vm5, %v1120_v60, 0 }
 0x459   :  { %v738_v23 = vpack.c.bf16 %v730_v11, %v730_v11 }
 0x45a   :  { %v276_v18 = vpack.c.bf16 %v3451_v5, %v3451_v5  ;;  %v275_v20 = vpack.c.bf16 %v3450_v7, %v3450_v7  ;;  %v739_v24 = vpack.c.bf16 %v731_v10, %v731_v10 }
 0x45b   :  { %v716_v63 = vpop.xlane.xlu1 %715  ;;  %v3454_v21 = vpop.permute.xlu0 %3453 }
 0x45c   :  { %3551 = vrcp.f32 %v716_v63  ;;  %v3456_v27 = vunpack.i.h.bf16 %v3454_v21  ;;  %v3455_v28 = vunpack.i.l.bf16 %v3454_v21  ;;  %v933_v29 = vsel %vm747_vm5, %v275_v20, 0 }
 0x45d   :  { %v979_v30 = vsel %vm747_vm5, %v276_v18, 0 }
 0x45e   :  { %v3548_v22 = vpop.eup %3547  ;;  %v278_v33 = vpack.c.bf16 %v3456_v27, %v3456_v27  ;;  %v277_v34 = vpack.c.bf16 %v3455_v28, %v3455_v28 }
 0x45f   :  { %v719_v1 = vpop.xlane.xlu1 %718  ;;  %v3550_v26 = vpop.eup %3549  ;;  %v732_v32 = vmul.f32 %v3548_v22, %v3839_v40 }
 0x460   :  { %3553 = vrcp.f32 %v719_v1  ;;  %v733_v31 = vmul.f32 %v3550_v26, %v3841_v43  ;;  %v1025_v39 = vsel %vm747_vm5, %v277_v34, 0  ;;  %v1071_v40 = vsel %vm747_vm5, %v278_v33, 0 }
 0x461   :  { %v740_v36 = vpack.c.bf16 %v732_v32, %v732_v32 }
 0x462   :  { %v741_v37 = vpack.c.bf16 %v733_v31, %v733_v31 }
 0x463   :  { %v3444_v6 = vpop.permute.xlu1 %3443 }
 0x464   :  { %v3446_v8 = vunpack.i.h.bf16 %v3444_v6  ;;  %v3445_v9 = vunpack.i.l.bf16 %v3444_v6 }
 0x466   :  { %v274_v13 = vpack.c.bf16 %v3446_v8, %v3446_v8  ;;  %v273_v17 = vpack.c.bf16 %v3445_v9, %v3445_v9  ;;  %v3552_v35 = vpop.eup %3551 }
 0x467   :  { %v734_v41 = vmul.f32 %v3552_v35, %v3851_v48  ;;  %v1172_v48 = vsel %vm747_vm5, %v1118_v47, 0 }
 0x468   :  { %v841_v14 = vsel %vm747_vm5, %v273_v17, 0  ;;  %v887_v19 = vsel %vm747_vm5, %v274_v13, 0 }
 0x469   :  { %3177 = vmatpush3.bf16.msra.mxu0 %v841_v14  ;;  %3183 = vmatpush3.bf16.msra.mxu1 %v887_v19  ;;  %v742_v43 = vpack.c.bf16 %v734_v41, %v734_v41 }
 0x46a   :  { %3188 = vmatprep.subr.bf16.mxu0 %v3604_v0  ;;  %3194 = vmatprep.subr.bf16.mxu1 %v3604_v0  ;;  %v3554_v38 = vpop.eup %3553 }
 0x46b   :  { %v735_v42 = vmul.f32 %v3554_v38, %v3855_v50 }
 0x46c   :  { %3179 = vmatmul.mubr.msk.bf16.vlgmr.msra.gmra.mrb[24].mxu0 %vm279_vm3, %v738_v23  ;;  %3185 = vmatmul.mubr.msk.bf16.vlgmr.msra.gmra.mrb[24].mxu1 %vm279_vm3, %v739_v24 }
 0x46d   :  { %3189 = vmatpush3.bf16.msra.mxu0 %v933_v29  ;;  %3195 = vmatpush3.bf16.msra.mxu1 %v979_v30  ;;  %v743_v44 = vpack.c.bf16 %v735_v42, %v735_v42 }
 0x46e   :  { %3190 = vmatprep.mubr.msk.bf16.mxu0 %vm3605_vm0, %v3604_v0  ;;  %3196 = vmatprep.mubr.msk.bf16.mxu1 %vm3605_vm0, %v3604_v0 }
 0x46f   :  { %3200 = vmatprep.subr.bf16.mxu0 %v3604_v0  ;;  %3206 = vmatprep.subr.bf16.mxu1 %v3604_v0 }
 0x474   :  { %3191 = vmatmul.mubr.msk.bf16.vlgmr.msra.gmra.mrb[28].mxu0 %vm279_vm3, %v740_v36  ;;  %3197 = vmatmul.mubr.msk.bf16.vlgmr.msra.gmra.mrb[28].mxu1 %vm279_vm3, %v741_v37 }
 0x475   :  { %3201 = vmatpush3.bf16.msra.mxu0 %v1025_v39  ;;  %3207 = vmatpush3.bf16.msra.mxu1 %v1071_v40 }
 0x476   :  { %3202 = vmatprep.mubr.msk.bf16.mxu0 %vm3605_vm0, %v3604_v0  ;;  %3208 = vmatprep.mubr.msk.bf16.mxu1 %vm3605_vm0, %v3604_v0 }
 0x477   :  { %3212 = vmatprep.subr.bf16.mxu0 %v3604_v0  ;;  %3218 = vmatprep.subr.bf16.mxu1 %v3604_v0 }
 0x47c   :  { %3203 = vmatmul.mubr.msk.bf16.vlgmr.msra.gmra.mrb[32].mxu0 %vm279_vm3, %v742_v43  ;;  %3209 = vmatmul.mubr.msk.bf16.vlgmr.msra.gmra.mrb[32].mxu1 %vm279_vm3, %v743_v44 }
 0x47d   :  { %3214 = vmatprep.mubr.msk.bf16.mxu0 %vm3605_vm0, %v3604_v0  ;;  %3220 = vmatprep.mubr.msk.bf16.mxu1 %vm3605_vm0, %v3604_v0 }
 0x47e   :  { %3213 = vmatpush3.bf16.msra.mxu0 %v1125_v46  ;;  %3219 = vmatpush3.bf16.msra.mxu1 %v1172_v48 }
 0x47f   :  { %3224 = vmatprep.subr.bf16.mxu0 %v3604_v0  ;;  %3230 = vmatprep.subr.bf16.mxu1 %v3604_v0 }
 0x526   :  { %v785_v50 = vpop.f32.mrb[20].mxu0 }
 0x527   :  { %v831_v51 = vpop.f32.mrb[20].mxu1  ;;  %v3168_v52 = vpop.f32.mrb[21].mxu0 }
 0x528   :  { %v1113_v53 = vpack.c.bf16 %v831_v51, %v785_v50  ;;  %v3174_v54 = vpop.f32.mrb[21].mxu1  ;;  %v788_v55 = vpop.f32.mrb[22].mxu0 }
 0x529   :  { %v834_v57 = vpop.f32.mrb[22].mxu1  ;;  %v3169_v58 = vpop.f32.mrb[23].mxu0 }
 0x52a   :  { %v3175_v59 = vpop.f32.mrb[23].mxu1  ;;  %3215 = vmatmul.mubr.msk.bf16.vlgmr.msra.gmra.mrb[36].mxu0 %vm279_vm3, %v1113_v53  ;;  %v2947_v53 = vld [vmem:[%s4263_s7] ss:$0 sm:$0xff] }
 0x52b   :  { %3225 = vmatpush3.bf16.msra.mxu0 %v1219_v56  ;;  %3226 = vmatprep.mubr.msk.bf16.mxu0 %vm3605_vm0, %v3604_v0 }
 0x52c   :  { %3236 = vmatprep.subr.bf16.mxu0 %v3604_v0 }
 0x53f   :  { %v877_v25 = vpop.f32.mrb[24].mxu0  ;;  %v923_v61 = vpop.f32.mrb[24].mxu1 }
 0x540   :  { %v1114_v62 = vpack.c.bf16 %v923_v61, %v877_v25  ;;  %v3180_v63 = vpop.f32.mrb[25].mxu0  ;;  %v3186_v1 = vpop.f32.mrb[25].mxu1 }
 0x541   :  { %v880_v3 = vpop.f32.mrb[26].mxu0  ;;  %v926_v4 = vpop.f32.mrb[26].mxu1 }
 0x542   :  { %v3181_v5 = vpop.f32.mrb[27].mxu0  ;;  %v3187_v6 = vpop.f32.mrb[27].mxu1  ;;  %3221 = vmatmul.mubr.msk.bf16.vlgmr.msra.gmra.mrb[36].mxu1 %vm279_vm3, %v1114_v62 }
 0x543   :  { %3231 = vmatpush3.bf16.msra.mxu1 %v1266_v2  ;;  %3232 = vmatprep.mubr.msk.bf16.mxu1 %vm3605_vm0, %v3604_v0 }
 0x544   :  { %3244 = vmatprep.subr.bf16.mxu1 %v3604_v0 }
 0x547   :  { %v969_v7 = vpop.f32.mrb[28].mxu0  ;;  %v1015_v8 = vpop.f32.mrb[28].mxu1 }
 0x548   :  { %v1115_v9 = vpack.c.bf16 %v1015_v8, %v969_v7  ;;  %v3192_v10 = vpop.f32.mrb[29].mxu0  ;;  %v3198_v11 = vpop.f32.mrb[29].mxu1 }
 0x549   :  { %v972_v13 = vpop.f32.mrb[30].mxu0  ;;  %v1018_v17 = vpop.f32.mrb[30].mxu1  ;;  %v3516_v11 = vld [vmem:[%s4264_s10 + $0x8] sm:$0xff]  }
 0x54a   :  { %v3193_v18 = vpop.f32.mrb[31].mxu0  ;;  %v3199_v20 = vpop.f32.mrb[31].mxu1  ;;  %3227 = vmatmul.mubr.msk.bf16.vlgmr.msra.gmra.mrb[40].mxu0 %vm279_vm3, %v1115_v9 }
 0x54b   :  { %3240 = vmatprep.mubr.msk.bf16.mxu0 %vm3605_vm0, %v3604_v0 }
 0x54f   :  { %v1061_v14 = vpop.f32.mrb[32].mxu0  ;;  %v1107_v19 = vpop.f32.mrb[32].mxu1 }
 0x550   :  { %v1116_v21 = vpack.c.bf16 %v1107_v19, %v1061_v14  ;;  %v3204_v22 = vpop.f32.mrb[33].mxu0  ;;  %v3210_v23 = vpop.f32.mrb[33].mxu1 }
 0x551   :  { %v1064_v24 = vpop.f32.mrb[34].mxu0  ;;  %v1110_v26 = vpop.f32.mrb[34].mxu1  ;;  %v2948_v22 = vld [vmem:[%s4265_s8] ss:$0 sm:$0xff] }
 0x552   :  { %v3205_v27 = vpop.f32.mrb[35].mxu0  ;;  %v3211_v28 = vpop.f32.mrb[35].mxu1  ;;  %3233 = vmatmul.mubr.msk.bf16.vlgmr.msra.gmra.mrb[40].mxu1 %vm279_vm3, %v1116_v21 }
 0x553   :  { %3248 = vmatprep.mubr.msk.bf16.mxu1 %vm3605_vm0, %v3604_v0  ;;  %v2949_v28 = vld [vmem:[%s4266_s9] ss:$0 sm:$0xff] }
 0x5fd   :  { %v1161_v29 = vpop.f32.mrb[36].mxu0 }
 0x5fe   :  { %v3216_v30 = vpop.f32.mrb[37].mxu0  ;;  %v1309_v34 = vsel %vm142_vm2, %v1161_v29, 0.0 }
 0x5ff   :  { %v1164_v31 = vpop.f32.mrb[38].mxu0 }
 0x600   :  { %v3217_v32 = vpop.f32.mrb[39].mxu0  ;;  %v1316_v39 = vsel %vm142_vm2, %v1164_v31, 0.0 }
 0x615   :  { %v1208_v33 = vpop.f32.mrb[36].mxu1 }
 0x616   :  { %v1310_v35 = vsel %vm142_vm2, %v1208_v33, 0.0  ;;  %v3222_v36 = vpop.f32.mrb[37].mxu1  ;;  %v2950_v33 = vld [vmem:[%s4267_s11] ss:$0 sm:$0xff] }
 0x617   :  { %v1311_v37 = vadd.f32 %v1310_v35, %v1309_v34  ;;  %v1211_v38 = vpop.f32.mrb[38].mxu1 }
 0x618   :  { %v1317_v40 = vsel %vm142_vm2, %v1211_v38, 0.0  ;;  %v3223_v41 = vpop.f32.mrb[39].mxu1 }
 0x619   :  { %v1318_v42 = vadd.f32 %v1317_v40, %v1316_v39 }
 0x61d   :  { %v1255_v43 = vpop.f32.mrb[40].mxu0 }
 0x61e   :  { %v1312_v44 = vsel %vm142_vm2, %v1255_v43, 0.0  ;;  %v3228_v45 = vpop.f32.mrb[41].mxu0 }
 0x61f   :  { %v1313_v46 = vadd.f32 %v1312_v44, %v1311_v37  ;;  %v1258_v47 = vpop.f32.mrb[42].mxu0 }
 0x620   :  { %v1319_v48 = vsel %vm142_vm2, %v1258_v47, 0.0  ;;  %v3229_v49 = vpop.f32.mrb[43].mxu0 }
 0x621   :  { %v1320_v50 = vadd.f32 %v1319_v48, %v1318_v42 }
 0x625   :  { %v1302_v51 = vpop.f32.mrb[40].mxu1 }
 0x626   :  { %v1314_v52 = vsel %vm142_vm2, %v1302_v51, 0.0  ;;  %v3234_v54 = vpop.f32.mrb[41].mxu1 }
 0x627   :  { %v1315_v55 = vadd.f32 %v1314_v52, %v1313_v46  ;;  %v1305_v56 = vpop.f32.mrb[42].mxu1 }
 0x628   :  { %v1321_v57 = vsel %vm142_vm2, %v1305_v56, 0.0  ;;  %v3235_v58 = vpop.f32.mrb[43].mxu1  ;;  %v3517_v56 = vld [vmem:[%s4258_s4 + $0x10] sm:$0xff]  }
 0x629   :  { %v1328_v59 = vadd.f32 %v2947_v53, %v1315_v55  ;;  %v1322_v60 = vadd.f32 %v1321_v57, %v1320_v50  ;;  %3245 = vmatpush3.bf16.msra.mxu1 %v3517_v56  ;;  %v3518_v57 = vld [vmem:[%s4258_s4 + $0x18] sm:$0xff]  }
 0x62a   :  { %3246 = vmatprep.subr.bf16.mxu1 %v3604_v0 }
 0x62b   :  { %v1329_v25 = vadd.f32 %v2947_v53, %v1322_v60  ;;  %v1330_v61 = vadd.f32 %v1328_v59, %v3735_v15 }
 0x62d   :  { %v1334_v62 = vsel %vm142_vm2, %v1330_v61, 0.0  ;;  %v1331_v63 = vadd.f32 %v1329_v25, %v3737_v16  ;;  %v3515_v16 = vld [vmem:[%s4264_s10] sm:$0xff]   ;;  %3247 = vmatpush3.bf16.msra.mxu1 %v3518_v57 }
 0x62e   :  { %1335 = vadd.xlane.f32.xlu1 %v1334_v62  ;;  %3237 = vmatpush3.bf16.msra.mxu0 %v3515_v16 }
 0x62f   :  { %v1337_v1 = vsel %vm142_vm2, %v1331_v63, 0.0  ;;  %3238 = vmatprep.subr.bf16.mxu0 %v3604_v0  ;;  %3258 = vmatprep.subr.bf16.mxu1 %v3604_v0 }
 0x630   :  { %1338 = vadd.xlane.f32.xlu0 %v1337_v1  ;;  %v2954_v1 = vld [vmem:[%s4268_s12] ss:$0 sm:$0xff] }
 0x632   :  { %3239 = vmatpush3.bf16.msra.mxu0 %v3516_v11 }
 0x633   :  { %3252 = vmatprep.subr.bf16.mxu0 %v3604_v0 }
 0x6bb   :  { %v1336_v2 = vpop.xlane.xlu1 %1335 }
 0x6bc   :  { %v1341_v3 = vmul.f32 0.03125, %v1336_v2 }
 0x6bd   :  { %v1339_v4 = vpop.xlane.xlu0 %1338 }
 0x6be   :  { %v1343_v5 = vsub.f32 %v1330_v61, %v1341_v3  ;;  %v1342_v6 = vmul.f32 0.03125, %v1339_v4  ;;  %v2955_v4 = vld [vmem:[%s4269_s13] ss:$0 sm:$0xff] }
 0x6c0   :  { %v1344_v7 = vsub.f32 %v1331_v63, %v1342_v6  ;;  %v1345_v8 = vmul.f32 %v1343_v5, %v1343_v5 }
 0x6c2   :  { %v1347_v9 = vsel %vm142_vm2, %v1345_v8, 0.0  ;;  %v1346_v10 = vmul.f32 %v1344_v7, %v1344_v7 }
 0x6c3   :  { %1348 = vadd.xlane.f32.xlu0 %v1347_v9 }
 0x6c4   :  { %v1350_v15 = vsel %vm142_vm2, %v1346_v10, 0.0  ;;  %v3603_v10 = vld [vmem:[%s4260_s1] sm:$0xff] }
 0x6c5   :  { %1351 = vadd.xlane.f32.xlu1 %v1350_v15 }
 0x750   :  { %v1349_v13 = vpop.xlane.xlu0 %1348 }
 0x751   :  { %v1353_v17 = vmul.f32 0.03125, %v1349_v13  ;;  %v2960_v13 = vld [vmem:[%s4261_s5 + $0x1] ss:$0 sm:$0xff] }
 0x752   :  { %v1352_v18 = vpop.xlane.xlu1 %1351 }
 0x753   :  { %v1355_v20 = vadd.f32 1e-05, %v1353_v17  ;;  %v1354_v14 = vmul.f32 0.03125, %v1352_v18 }
 0x755   :  { %3555 = vrsqrt.f32 %v1355_v20  ;;  %v1356_v19 = vadd.f32 1e-05, %v1354_v14 }
 0x757   :  { %3557 = vrsqrt.f32 %v1356_v19 }
 0x75f   :  { %v3556_v21 = vpop.eup %3555 }
 0x760   :  { %v1359_v23 = vmul.f32 %v3556_v21, %v1343_v5 }
 0x761   :  { %v3558_v24 = vpop.eup %3557 }
 0x762   :  { %v1365_v26 = vmul.f32 %v2948_v22, %v1359_v23  ;;  %v1360_v27 = vmul.f32 %v3558_v24, %v1344_v7 }
 0x764   :  { %v1366_v29 = vmul.f32 %v2948_v22, %v1360_v27  ;;  %v1371_v30 = vadd.f32 %v2949_v28, %v1365_v26 }
 0x766   :  { %v1372_v31 = vadd.f32 %v2949_v28, %v1366_v29 }
 0x768   :  { %v1373_v32 = vpack.c.bf16 %v1372_v31, %v1371_v30 }
 0x76a   :  { %3241 = vmatmul.mubr.msk.bf16.vlgmr.msra.gmra.mrb[44].mxu0 %vm142_vm2, %v1373_v32 }
 0x76b   :  { %3254 = vmatprep.mubr.msk.bf16.mxu0 %vm3605_vm0, %v3604_v0 }
 0x83d   :  { %v1432_v34 = vpop.f32.mrb[44].mxu0 }
 0x83e   :  { %v1433_v35 = vadd.f32 %v2950_v33, %v1432_v34  ;;  %v3242_v36 = vpop.f32.mrb[45].mxu0 }
 0x83f   :  { %v1435_v37 = vpop.f32.mrb[46].mxu0 }
 0x840   :  { %v1439_v38 = vmax.f32 %v1433_v35, 0.0  ;;  %v1436_v39 = vadd.f32 %v2950_v33, %v1435_v37  ;;  %v3243_v40 = vpop.f32.mrb[47].mxu0 }
 0x842   :  { %v1440_v41 = vmax.f32 %v1436_v39, 0.0  ;;  %v1441_v42 = vadd.f32 %v1439_v38, %v1371_v30 }
 0x844   :  { %v1445_v43 = vsel %vm142_vm2, %v1441_v42, 0.0  ;;  %v1442_v44 = vadd.f32 %v1440_v41, %v1372_v31 }
 0x845   :  { %1446 = vadd.xlane.f32.xlu0 %v1445_v43 }
 0x846   :  { %v1448_v45 = vsel %vm142_vm2, %v1442_v44, 0.0 }
 0x847   :  { %1449 = vadd.xlane.f32.xlu1 %v1448_v45 }
 0x8d2   :  { %v1447_v46 = vpop.xlane.xlu0 %1446 }
 0x8d3   :  { %v1451_v47 = vmul.f32 0.03125, %v1447_v46 }
 0x8d4   :  { %v1450_v48 = vpop.xlane.xlu1 %1449 }
 0x8d5   :  { %v1453_v49 = vsub.f32 %v1441_v42, %v1451_v47  ;;  %v1452_v50 = vmul.f32 0.03125, %v1450_v48 }
 0x8d7   :  { %v1454_v51 = vsub.f32 %v1442_v44, %v1452_v50  ;;  %v1455_v52 = vmul.f32 %v1453_v49, %v1453_v49 }
 0x8d9   :  { %v1457_v53 = vsel %vm142_vm2, %v1455_v52, 0.0  ;;  %v1456_v54 = vmul.f32 %v1454_v51, %v1454_v51 }
 0x8da   :  { %1458 = vadd.xlane.f32.xlu0 %v1457_v53 }
 0x8db   :  { %v1460_v55 = vsel %vm142_vm2, %v1456_v54, 0.0 }
 0x8dc   :  { %1461 = vadd.xlane.f32.xlu1 %v1460_v55 }
 0x967   :  { %v1459_v58 = vpop.xlane.xlu0 %1458 }
 0x968   :  { %v1463_v59 = vmul.f32 0.03125, %v1459_v58 }
 0x969   :  { %v1462_v60 = vpop.xlane.xlu1 %1461 }
 0x96a   :  { %v1465_v25 = vadd.f32 1e-05, %v1463_v59  ;;  %v1464_v61 = vmul.f32 0.03125, %v1462_v60 }
 0x96c   :  { %3559 = vrsqrt.f32 %v1465_v25  ;;  %v1466_v62 = vadd.f32 1e-05, %v1464_v61 }
 0x96e   :  { %3561 = vrsqrt.f32 %v1466_v62 }
 0x976   :  { %v3560_v63 = vpop.eup %3559 }
 0x977   :  { %v1469_v2 = vmul.f32 %v3560_v63, %v1453_v49 }
 0x978   :  { %v3562_v3 = vpop.eup %3561 }
 0x979   :  { %v1475_v5 = vmul.f32 %v2954_v1, %v1469_v2  ;;  %v1470_v6 = vmul.f32 %v3562_v3, %v1454_v51 }
 0x97b   :  { %v1476_v7 = vmul.f32 %v2954_v1, %v1470_v6  ;;  %v1481_v8 = vadd.f32 %v2955_v4, %v1475_v5 }
 0x97d   :  { %v1482_v9 = vadd.f32 %v2955_v4, %v1476_v7  ;;  %v3999_v15 = vadd.f32 %v3603_v10, %v1481_v8 }
 0x97f   :  { %v4001_v16 = vadd.f32 %v3603_v10, %v1482_v9 }
 0x981   :  { %v1485_v11 = vpack.c.bf16 %v4001_v16, %v3999_v15 }
 0x983   :  { %3249 = vmatmul.mubr.msk.bf16.vlgmr.msra.gmra.mrb[44].mxu1 %vm142_vm2, %v1485_v11 }
 0x984   :  { %3260 = vmatprep.mubr.msk.bf16.mxu1 %vm3605_vm0, %v3604_v0 }
 0xa56   :  { %v1545_v17 = vpop.f32.mrb[44].mxu1 }
 0xa57   :  { %v3250_v18 = vpop.f32.mrb[45].mxu1  ;;  %v1546_v14 = vadd.f32 %v2960_v13, %v1545_v17 }
 0xa58   :  { %v1548_v20 = vpop.f32.mrb[46].mxu1 }
 0xa59   :  { %v1549_v19 = vadd.f32 %v2960_v13, %v1548_v20  ;;  %v3251_v21 = vpop.f32.mrb[47].mxu1  ;;  %v1620_v37 = vpack.c.bf16 %v1546_v14, %v1546_v14 }
 0xa5b   :  { %v4011_v22 = vpack.i.bf16 %v1549_v19, %v1546_v14  ;;  %v1621_v39 = vpack.c.bf16 %v1549_v19, %v1549_v19 }
 0xa5d   :  { %3463 = vrot.lane.b32.xlu1 %v4011_v22, %s3609_s24  ;;  %3458 = vrot.lane.b32.xlu0 %v4011_v22, %s3607_s22 }
 0xa61   :  { %3468 = vrot.lane.b32.xlu1 %v4011_v22, %s3606_s21  ;;  %3473 = vrot.lane.b32.xlu0 %v4011_v22, %s3608_s23 }
 0xa65   :  { %3478 = vrot.lane.b32.xlu1 %v4011_v22, %s3611_s26  ;;  %3483 = vrot.lane.b32.xlu0 %v4011_v22, %s3610_s25 }
 0xa69   :  { %3488 = vrot.lane.b32.xlu1 %v4011_v22, %s3612_s27 }
 0xacf   :  { %v3459_v23 = vpop.permute.xlu0 %3458  ;;  %v3464_v27 = vpop.permute.xlu1 %3463 }
 0xad0   :  { %v3461_v24 = vunpack.i.h.bf16 %v3459_v23  ;;  %v3460_v26 = vunpack.i.l.bf16 %v3459_v23  ;;  %v3465_v30 = vunpack.i.l.bf16 %v3464_v27  ;;  %v3466_v33 = vunpack.i.h.bf16 %v3464_v27 }
 0xad2   :  { %v1629_v28 = vpack.c.bf16 %v3461_v24, %v3461_v24  ;;  %v1628_v29 = vpack.c.bf16 %v3460_v26, %v3460_v26  ;;  %v1630_v34 = vpack.c.bf16 %v3465_v30, %v3465_v30  ;;  %v1631_v35 = vpack.c.bf16 %v3466_v33, %v3466_v33 }
 0xad3   :  { %v3474_v36 = vpop.permute.xlu0 %3473  ;;  %v3469_v38 = vpop.permute.xlu1 %3468 }
 0xad4   :  { %v1648_v31 = vsel %vm279_vm3, %v1628_v29, 0  ;;  %v1694_v32 = vsel %vm279_vm3, %v1629_v28, 0  ;;  %v3475_v40 = vunpack.i.l.bf16 %v3474_v36  ;;  %v1740_v41 = vsel %vm279_vm3, %v1630_v34, 0 }
 0xad5   :  { %3253 = vmatpush3.bf16.xpose.msra.mxu0 %v1648_v31  ;;  %3259 = vmatpush3.bf16.xpose.msra.mxu1 %v1694_v32  ;;  %v3476_v42 = vunpack.i.h.bf16 %v3474_v36  ;;  %v1786_v43 = vsel %vm279_vm3, %v1631_v35, 0  ;;  %v3470_v44 = vunpack.i.l.bf16 %v3469_v38  ;;  %v3471_v45 = vunpack.i.h.bf16 %v3469_v38 }
 0xad6   :  { %3264 = vmatprep.subr.bf16.mxu0 %v3604_v0  ;;  %3270 = vmatprep.subr.bf16.mxu1 %v3604_v0  ;;  %v1632_v46 = vpack.c.bf16 %v3475_v40, %v3475_v40 }
 0xad7   :  { %v1633_v47 = vpack.c.bf16 %v3476_v42, %v3476_v42  ;;  %v3484_v48 = vpop.permute.xlu0 %3483  ;;  %v1622_v49 = vpack.c.bf16 %v3470_v44, %v3470_v44  ;;  %v1623_v50 = vpack.c.bf16 %v3471_v45, %v3471_v45  ;;  %v3479_v51 = vpop.permute.xlu1 %3478 }
 0xad8   :  { %v3485_v52 = vunpack.i.l.bf16 %v3484_v48  ;;  %v1832_v53 = vsel %vm279_vm3, %v1632_v46, 0  ;;  %v3486_v54 = vunpack.i.h.bf16 %v3484_v48  ;;  %v3480_v56 = vunpack.i.l.bf16 %v3479_v51 }
 0xad9   :  { %v1878_v55 = vsel %vm279_vm3, %v1633_v47, 0  ;;  %v3481_v57 = vunpack.i.h.bf16 %v3479_v51 }
 0xada   :  { %v1634_v58 = vpack.c.bf16 %v3485_v52, %v3485_v52  ;;  %v1635_v59 = vpack.c.bf16 %v3486_v54, %v3486_v54  ;;  %v1624_v60 = vpack.c.bf16 %v3480_v56, %v3480_v56 }
 0xadb   :  { %v1625_v25 = vpack.c.bf16 %v3481_v57, %v3481_v57  ;;  %v3489_v61 = vpop.permute.xlu1 %3488 }
 0xadc   :  { %3255 = vmatmul.mubr.msk.bf16.vlgmr.msra.gmra.mrb[48].mxu0 %vm279_vm3, %v1620_v37  ;;  %3261 = vmatmul.mubr.msk.bf16.vlgmr.msra.gmra.mrb[48].mxu1 %vm279_vm3, %v1621_v39  ;;  %v1924_v62 = vsel %vm279_vm3, %v1634_v58, 0  ;;  %v1970_v63 = vsel %vm279_vm3, %v1635_v59, 0  ;;  %v3490_v1 = vunpack.i.l.bf16 %v3489_v61  ;;  %v3491_v2 = vunpack.i.h.bf16 %v3489_v61 }
 0xadd   :  { %3265 = vmatpush3.bf16.xpose.msra.mxu0 %v1740_v41  ;;  %3271 = vmatpush3.bf16.xpose.msra.mxu1 %v1786_v43 }
 0xade   :  { %3266 = vmatprep.mubr.msk.bf16.mxu0 %vm3605_vm0, %v3604_v0  ;;  %3272 = vmatprep.mubr.msk.bf16.mxu1 %vm3605_vm0, %v3604_v0  ;;  %v1626_v3 = vpack.c.bf16 %v3490_v1, %v3490_v1  ;;  %v1627_v4 = vpack.c.bf16 %v3491_v2, %v3491_v2 }
 0xadf   :  { %3276 = vmatprep.subr.bf16.mxu0 %v3604_v0  ;;  %3282 = vmatprep.subr.bf16.mxu1 %v3604_v0 }
 0xae4   :  { %3267 = vmatmul.mubr.msk.bf16.vlgmr.msra.gmra.mrb[52].mxu0 %vm279_vm3, %v1622_v49  ;;  %3273 = vmatmul.mubr.msk.bf16.vlgmr.msra.gmra.mrb[52].mxu1 %vm279_vm3, %v1623_v50 }
 0xae5   :  { %3277 = vmatpush3.bf16.xpose.msra.mxu0 %v1832_v53  ;;  %3283 = vmatpush3.bf16.xpose.msra.mxu1 %v1878_v55 }
 0xae6   :  { %3278 = vmatprep.mubr.msk.bf16.mxu0 %vm3605_vm0, %v3604_v0  ;;  %3284 = vmatprep.mubr.msk.bf16.mxu1 %vm3605_vm0, %v3604_v0 }
 0xae7   :  { %3288 = vmatprep.subr.bf16.mxu0 %v3604_v0  ;;  %3294 = vmatprep.subr.bf16.mxu1 %v3604_v0 }
 0xaec   :  { %3279 = vmatmul.mubr.msk.bf16.vlgmr.msra.gmra.mrb[56].mxu0 %vm279_vm3, %v1624_v60  ;;  %3285 = vmatmul.mubr.msk.bf16.vlgmr.msra.gmra.mrb[56].mxu1 %vm279_vm3, %v1625_v25 }
 0xaed   :  { %3289 = vmatpush3.bf16.xpose.msra.mxu0 %v1924_v62  ;;  %3295 = vmatpush3.bf16.xpose.msra.mxu1 %v1970_v63 }
 0xaee   :  { %3290 = vmatprep.mubr.msk.bf16.mxu0 %vm3605_vm0, %v3604_v0  ;;  %3296 = vmatprep.mubr.msk.bf16.mxu1 %vm3605_vm0, %v3604_v0 }
 0xaef   :  { %3300 = vmatprep.subr.bf16.mxu0 %v3604_v0  ;;  %3306 = vmatprep.subr.bf16.mxu1 %v3604_v0 }
 0xaf4   :  { %3291 = vmatmul.mubr.msk.bf16.vlgmr.msra.gmra.mrb[60].mxu0 %vm279_vm3, %v1626_v3  ;;  %3297 = vmatmul.mubr.msk.bf16.vlgmr.msra.gmra.mrb[60].mxu1 %vm279_vm3, %v1627_v4 }
 0xaf5   :  { %3302 = vmatprep.mubr.msk.bf16.mxu0 %vm3605_vm0, %v3604_v0  ;;  %3308 = vmatprep.mubr.msk.bf16.mxu1 %vm3605_vm0, %v3604_v0 }
 0xbaf   :  { %v1684_v5 = vpop.f32.mrb[48].mxu0  ;;  %v1730_v7 = vpop.f32.mrb[48].mxu1 }
 0xbb0   :  { %v1685_v6 = vadd.f32 %v1684_v5, %v3803_v12  ;;  %v3256_v8 = vpop.f32.mrb[49].mxu0  ;;  %v1731_v9 = vadd.f32 %v1730_v7, %v3803_v12  ;;  %v3262_v10 = vpop.f32.mrb[49].mxu1 }
 0xbb1   :  { %v1687_v11 = vpop.f32.mrb[50].mxu0  ;;  %v1733_v13 = vpop.f32.mrb[50].mxu1 }
 0xbb2   :  { %v3257_v17 = vpop.f32.mrb[51].mxu0  ;;  %v2012_v18 = vsel %vm279_vm3, %v1685_v6, -inf  ;;  %v3263_v20 = vpop.f32.mrb[51].mxu1  ;;  %v2015_v14 = vsel %vm279_vm3, %v1731_v9, -inf }
 0xbb3   :  { %2013 = vmax.xlane.f32.xlu0 %v2012_v18  ;;  %2016 = vmax.xlane.f32.xlu1 %v2015_v14 }
 0xbb7   :  { %v1776_v19 = vpop.f32.mrb[52].mxu0  ;;  %v1822_v23 = vpop.f32.mrb[52].mxu1 }
 0xbb8   :  { %v1777_v21 = vadd.f32 %v1776_v19, %v3803_v12  ;;  %v3268_v24 = vpop.f32.mrb[53].mxu0  ;;  %v3274_v26 = vpop.f32.mrb[53].mxu1  ;;  %v1823_v28 = vadd.f32 %v1822_v23, %v3803_v12 }
 0xbb9   :  { %v1779_v27 = vpop.f32.mrb[54].mxu0  ;;  %v1825_v29 = vpop.f32.mrb[54].mxu1 }
 0xbba   :  { %v3269_v30 = vpop.f32.mrb[55].mxu0  ;;  %v2018_v31 = vsel %vm279_vm3, %v1777_v21, -inf  ;;  %v3275_v32 = vpop.f32.mrb[55].mxu1  ;;  %v2021_v33 = vsel %vm279_vm3, %v1823_v28, -inf }
 0xbbb   :  { %2019 = vmax.xlane.f32.xlu0 %v2018_v31 }
 0xbbf   :  { %2022 = vmax.xlane.f32.xlu0 %v2021_v33  ;;  %v1868_v34 = vpop.f32.mrb[56].mxu0  ;;  %v1914_v35 = vpop.f32.mrb[56].mxu1 }
 0xbc0   :  { %v1869_v36 = vadd.f32 %v1868_v34, %v3803_v12  ;;  %v3280_v37 = vpop.f32.mrb[57].mxu0  ;;  %v1915_v38 = vadd.f32 %v1914_v35, %v3803_v12  ;;  %v3286_v39 = vpop.f32.mrb[57].mxu1 }
 0xbc1   :  { %v1871_v40 = vpop.f32.mrb[58].mxu0  ;;  %v1917_v41 = vpop.f32.mrb[58].mxu1 }
 0xbc2   :  { %v3281_v42 = vpop.f32.mrb[59].mxu0  ;;  %v2024_v43 = vsel %vm279_vm3, %v1869_v36, -inf  ;;  %v3287_v44 = vpop.f32.mrb[59].mxu1  ;;  %v2027_v45 = vsel %vm279_vm3, %v1915_v38, -inf }
 0xbc3   :  { %2025 = vmax.xlane.f32.xlu1 %v2024_v43  ;;  %2028 = vmax.xlane.f32.xlu0 %v2027_v45 }
 0xbc7   :  { %v1960_v46 = vpop.f32.mrb[60].mxu0  ;;  %v2006_v48 = vpop.f32.mrb[60].mxu1 }
 0xbc8   :  { %v1961_v47 = vadd.f32 %v1960_v46, %v3803_v12  ;;  %v3292_v49 = vpop.f32.mrb[61].mxu0  ;;  %v2007_v50 = vadd.f32 %v2006_v48, %v3803_v12  ;;  %v3298_v51 = vpop.f32.mrb[61].mxu1 }
 0xbc9   :  { %v1963_v52 = vpop.f32.mrb[62].mxu0  ;;  %v2009_v53 = vpop.f32.mrb[62].mxu1 }
 0xbca   :  { %v3293_v54 = vpop.f32.mrb[63].mxu0  ;;  %v2030_v55 = vsel %vm279_vm3, %v1961_v47, -inf  ;;  %v3299_v56 = vpop.f32.mrb[63].mxu1  ;;  %v2033_v57 = vsel %vm279_vm3, %v2007_v50, -inf }
 0xbcb   :  { %2031 = vmax.xlane.f32.xlu1 %v2030_v55  ;;  %2034 = vmax.xlane.f32.xlu0 %v2033_v57 }
 0xbdc   :  { %3493 = vrot.lane.b32.xlu1 %v4011_v22, %s3614_s28 }
 0xc40   :  { %v2014_v58 = vpop.xlane.xlu0 %2013  ;;  %v2017_v59 = vpop.xlane.xlu1 %2016 }
 0xc41   :  { %v2036_v60 = vsub.f32 %v1685_v6, %v2014_v58  ;;  %v2037_v25 = vsub.f32 %v1731_v9, %v2017_v59 }
 0xc43   :  { %v2044_v61 = vmul.f32 1.442695, %v2036_v60  ;;  %v2046_v12 = vmul.f32 1.442695, %v2037_v25 }
 0xc45   :  { %3563 = vpow2.f32 %v2044_v61 }
 0xc46   :  { %3565 = vpow2.f32 %v2046_v12 }
 0xc48   :  { %v2020_v62 = vpop.xlane.xlu0 %2019 }
 0xc49   :  { %v2038_v63 = vsub.f32 %v1777_v21, %v2020_v62 }
 0xc4b   :  { %v2048_v1 = vmul.f32 1.442695, %v2038_v63 }
 0xc4c   :  { %v2023_v2 = vpop.xlane.xlu0 %2022 }
 0xc4d   :  { %3567 = vpow2.f32 %v2048_v1  ;;  %v2039_v3 = vsub.f32 %v1823_v28, %v2023_v2 }
 0xc4f   :  { %v3564_v4 = vpop.eup %3563  ;;  %v2050_v5 = vmul.f32 1.442695, %v2039_v3 }
 0xc50   :  { %v3566_v7 = vpop.eup %3565  ;;  %v2026_v8 = vpop.xlane.xlu1 %2025  ;;  %v2060_v10 = vsel %vm279_vm3, %v3564_v4, 0.0 }
 0xc51   :  { %3569 = vpow2.f32 %v2050_v5  ;;  %v2029_v11 = vpop.xlane.xlu0 %2028  ;;  %v2040_v6 = vsub.f32 %v1869_v36, %v2026_v8  ;;  %v2063_v9 = vsel %vm279_vm3, %v3566_v7, 0.0  ;;  %2061 = vadd.xlane.f32.xlu1 %v2060_v10 }
 0xc52   :  { %v2041_v13 = vsub.f32 %v1915_v38, %v2029_v11  ;;  %2064 = vadd.xlane.f32.xlu0 %v2063_v9 }
 0xc53   :  { %v2052_v17 = vmul.f32 1.442695, %v2040_v6 }
 0xc54   :  { %v2054_v18 = vmul.f32 1.442695, %v2041_v13 }
 0xc55   :  { %3571 = vpow2.f32 %v2052_v17 }
 0xc56   :  { %3573 = vpow2.f32 %v2054_v18 }
 0xc57   :  { %v4087_v20 = vpop.eup %3567 }
 0xc58   :  { %v2032_v14 = vpop.xlane.xlu1 %2031  ;;  %v2066_v19 = vsel %vm279_vm3, %v4087_v20, 0.0  ;;  %v2035_v21 = vpop.xlane.xlu0 %2034 }
 0xc59   :  { %v2042_v23 = vsub.f32 %v1961_v47, %v2032_v14  ;;  %2067 = vadd.xlane.f32.xlu1 %v2066_v19  ;;  %v2043_v24 = vsub.f32 %v2007_v50, %v2035_v21 }
 0xc5b   :  { %v4091_v26 = vpop.eup %3569  ;;  %v2056_v27 = vmul.f32 1.442695, %v2042_v23  ;;  %v2058_v28 = vmul.f32 1.442695, %v2043_v24 }
 0xc5c   :  { %v3494_v29 = vpop.permute.xlu1 %3493  ;;  %v2069_v30 = vsel %vm279_vm3, %v4091_v26, 0.0 }
 0xc5d   :  { %3575 = vpow2.f32 %v2056_v27  ;;  %v3496_v31 = vunpack.i.h.bf16 %v3494_v29  ;;  %v3495_v32 = vunpack.i.l.bf16 %v3494_v29  ;;  %2070 = vadd.xlane.f32.xlu0 %v2069_v30 }
 0xc5e   :  { %3577 = vpow2.f32 %v2058_v28 }
 0xc5f   :  { %v4095_v33 = vpop.eup %3571  ;;  %v1637_v34 = vpack.c.bf16 %v3496_v31, %v3496_v31  ;;  %v1636_v35 = vpack.c.bf16 %v3495_v32, %v3495_v32 }
 0xc60   :  { %v4097_v36 = vpop.eup %3573  ;;  %v2072_v37 = vsel %vm279_vm3, %v4095_v33, 0.0 }
 0xc61   :  { %v2075_v38 = vsel %vm279_vm3, %v4097_v36, 0.0  ;;  %2073 = vadd.xlane.f32.xlu1 %v2072_v37  ;;  %v2112_v39 = vsel %vm747_vm5, %v1636_v35, 0  ;;  %v2158_v40 = vsel %vm747_vm5, %v1637_v34, 0  ;;  %v2980_v37 = vld [vmem:[%s4262_s6 + $0x10] sm:$0xf] }
 0xc62   :  { %2076 = vadd.xlane.f32.xlu0 %v2075_v38  ;;  %3301 = vmatpush3.bf16.msra.mxu0 %v2112_v39  ;;  %v2489_v38 = vsel %vm747_vm5, %v2980_v37, 0  ;;  %v2981_v39 = vld [vmem:[%s4262_s6 + $0x14] sm:$0xf] }
 0xc63   :  { %3307 = vmatpush3.bf16.msra.mxu1 %v2158_v40  ;;  %3312 = vmatprep.subr.bf16.mxu0 %v3604_v0  ;;  %v2536_v40 = vsel %vm747_vm5, %v2981_v39, 0 }
 0xc64   :  { %3318 = vmatprep.subr.bf16.mxu1 %v3604_v0 }
 0xc67   :  { %v4107_v41 = vpop.eup %3575 }
 0xc68   :  { %v2078_v42 = vsel %vm279_vm3, %v4107_v41, 0.0  ;;  %v4111_v43 = vpop.eup %3577 }
 0xc69   :  { %2079 = vadd.xlane.f32.xlu0 %v2078_v42  ;;  %v2081_v44 = vsel %vm279_vm3, %v4111_v43, 0.0 }
 0xc6d   :  { %2082 = vadd.xlane.f32.xlu0 %v2081_v44 }
 0xc72   :  { %3503 = vrot.lane.b32.xlu1 %v4011_v22, %s3615_s29 }
 0xc76   :  { %3508 = vrot.lane.b32.xlu1 %v4011_v22, %s3616_s0 }
 0xc83   :  { %3498 = vrot.lane.b32.xlu0 %v4011_v22, %s3617_s30 }
 0xcde   :  { %v2062_v45 = vpop.xlane.xlu1 %2061 }
 0xcdf   :  { %v2065_v46 = vpop.xlane.xlu0 %2064  ;;  %3579 = vrcp.f32 %v2062_v45 }
 0xce0   :  { %3581 = vrcp.f32 %v2065_v46 }
 0xce6   :  { %v2068_v54 = vpop.xlane.xlu1 %2067 }
 0xce7   :  { %3583 = vrcp.f32 %v2068_v54 }
 0xce9   :  { %v3580_v47 = vpop.eup %3579 }
 0xcea   :  { %v3582_v48 = vpop.eup %3581  ;;  %v2092_v49 = vmul.f32 %v3580_v47, %v3564_v4  ;;  %v2071_v51 = vpop.xlane.xlu0 %2070 }
 0xceb   :  { %v2093_v50 = vmul.f32 %v3582_v48, %v3566_v7  ;;  %3585 = vrcp.f32 %v2071_v51 }
 0xcec   :  { %v2100_v52 = vpack.c.bf16 %v2092_v49, %v2092_v49 }
 0xced   :  { %v2101_v53 = vpack.c.bf16 %v2093_v50, %v2093_v50 }
 0xcee   :  { %3303 = vmatmul.mubr.msk.bf16.vlgmr.msra.gmra.mrb[64].mxu0 %vm279_vm3, %v2100_v52  ;;  %v2074_v55 = vpop.xlane.xlu1 %2073  ;;  %v2983_v52 = vld [vmem:[%s4262_s6 + $0x1c] sm:$0xf] }
 0xcef   :  { %3309 = vmatmul.mubr.msk.bf16.vlgmr.msra.gmra.mrb[64].mxu1 %vm279_vm3, %v2101_v53  ;;  %3314 = vmatprep.mubr.msk.bf16.mxu0 %vm3605_vm0, %v3604_v0  ;;  %v2077_v22 = vpop.xlane.xlu0 %2076  ;;  %3587 = vrcp.f32 %v2074_v55 }
 0xcf0   :  { %3320 = vmatprep.mubr.msk.bf16.mxu1 %vm3605_vm0, %v3604_v0  ;;  %3589 = vrcp.f32 %v2077_v22 }
 0xcf1   :  { %v3584_v59 = vpop.eup %3583 }
 0xcf2   :  { %v3504_v58 = vpop.permute.xlu1 %3503  ;;  %v2094_v1 = vmul.f32 %v3584_v59, %v4087_v20 }
 0xcf3   :  { %v3506_v25 = vunpack.i.h.bf16 %v3504_v58  ;;  %v3505_v12 = vunpack.i.l.bf16 %v3504_v58 }
 0xcf4   :  { %v2102_v9 = vpack.c.bf16 %v2094_v1, %v2094_v1 }
 0xcf5   :  { %v3586_v60 = vpop.eup %3585  ;;  %v1641_v5 = vpack.c.bf16 %v3506_v25, %v3506_v25  ;;  %v1640_v7 = vpack.c.bf16 %v3505_v12, %v3505_v12 }
 0xcf6   :  { %v2080_v56 = vpop.xlane.xlu0 %2079  ;;  %v2095_v2 = vmul.f32 %v3586_v60, %v4091_v26  ;;  %v3509_v11 = vpop.permute.xlu1 %3508 }
 0xcf7   :  { %3591 = vrcp.f32 %v2080_v56  ;;  %v3511_v18 = vunpack.i.h.bf16 %v3509_v11  ;;  %v3510_v20 = vunpack.i.l.bf16 %v3509_v11  ;;  %v2296_v14 = vsel %vm747_vm5, %v1640_v7, 0 }
 0xcf8   :  { %v2103_v13 = vpack.c.bf16 %v2095_v2, %v2095_v2  ;;  %v2342_v19 = vsel %vm747_vm5, %v1641_v5, 0 }
 0xcf9   :  { %v3588_v6 = vpop.eup %3587  ;;  %v1643_v24 = vpack.c.bf16 %v3511_v18, %v3511_v18  ;;  %v1642_v26 = vpack.c.bf16 %v3510_v20, %v3510_v20 }
 0xcfa   :  { %v2083_v57 = vpop.xlane.xlu0 %2082  ;;  %v3590_v17 = vpop.eup %3589  ;;  %v2096_v23 = vmul.f32 %v3588_v6, %v4095_v33 }
 0xcfb   :  { %3593 = vrcp.f32 %v2083_v57  ;;  %v2097_v21 = vmul.f32 %v3590_v17, %v4097_v36  ;;  %v2388_v31 = vsel %vm747_vm5, %v1642_v26, 0  ;;  %v2434_v32 = vsel %vm747_vm5, %v1643_v24, 0 }
 0xcfc   :  { %v2104_v28 = vpack.c.bf16 %v2096_v23, %v2096_v23  ;;  %v2630_v57 = vsel %vm747_vm5, %v2983_v52, 0 }
 0xcfd   :  { %v2105_v29 = vpack.c.bf16 %v2097_v21, %v2097_v21 }
 0xcfe   :  { %v3499_v61 = vpop.permute.xlu0 %3498 }
 0xcff   :  { %v3501_v62 = vunpack.i.h.bf16 %v3499_v61  ;;  %v3500_v63 = vunpack.i.l.bf16 %v3499_v61 }
 0xd01   :  { %v1639_v3 = vpack.c.bf16 %v3501_v62, %v3501_v62  ;;  %v1638_v4 = vpack.c.bf16 %v3500_v63, %v3500_v63  ;;  %v3592_v27 = vpop.eup %3591 }
 0xd02   :  { %v2098_v33 = vmul.f32 %v3592_v27, %v4107_v41  ;;  %v2982_v41 = vld [vmem:[%s4262_s6 + $0x18] sm:$0xf] }
 0xd03   :  { %v2204_v8 = vsel %vm747_vm5, %v1638_v4, 0  ;;  %v2250_v10 = vsel %vm747_vm5, %v1639_v3, 0  ;;  %v2583_v48 = vsel %vm747_vm5, %v2982_v41, 0 }
 0xd04   :  { %3313 = vmatpush3.bf16.msra.mxu0 %v2204_v8  ;;  %3319 = vmatpush3.bf16.msra.mxu1 %v2250_v10  ;;  %v2106_v35 = vpack.c.bf16 %v2098_v33, %v2098_v33 }
 0xd05   :  { %3324 = vmatprep.subr.bf16.mxu0 %v3604_v0  ;;  %3330 = vmatprep.subr.bf16.mxu1 %v3604_v0  ;;  %v3594_v30 = vpop.eup %3593 }
 0xd06   :  { %v2099_v34 = vmul.f32 %v3594_v30, %v4111_v43 }
 0xd07   :  { %3315 = vmatmul.mubr.msk.bf16.vlgmr.msra.gmra.mrb[68].mxu0 %vm279_vm3, %v2102_v9  ;;  %3321 = vmatmul.mubr.msk.bf16.vlgmr.msra.gmra.mrb[68].mxu1 %vm279_vm3, %v2103_v13 }
 0xd08   :  { %3325 = vmatpush3.bf16.msra.mxu0 %v2296_v14  ;;  %3331 = vmatpush3.bf16.msra.mxu1 %v2342_v19  ;;  %v2107_v36 = vpack.c.bf16 %v2099_v34, %v2099_v34 }
 0xd09   :  { %3326 = vmatprep.mubr.msk.bf16.mxu0 %vm3605_vm0, %v3604_v0  ;;  %3332 = vmatprep.mubr.msk.bf16.mxu1 %vm3605_vm0, %v3604_v0 }
 0xd0a   :  { %3336 = vmatprep.subr.bf16.mxu0 %v3604_v0  ;;  %3342 = vmatprep.subr.bf16.mxu1 %v3604_v0 }
 0xd0f   :  { %3327 = vmatmul.mubr.msk.bf16.vlgmr.msra.gmra.mrb[72].mxu0 %vm279_vm3, %v2104_v28  ;;  %3333 = vmatmul.mubr.msk.bf16.vlgmr.msra.gmra.mrb[72].mxu1 %vm279_vm3, %v2105_v29 }
 0xd10   :  { %3337 = vmatpush3.bf16.msra.mxu0 %v2388_v31  ;;  %3343 = vmatpush3.bf16.msra.mxu1 %v2434_v32 }
 0xd11   :  { %3338 = vmatprep.mubr.msk.bf16.mxu0 %vm3605_vm0, %v3604_v0  ;;  %3344 = vmatprep.mubr.msk.bf16.mxu1 %vm3605_vm0, %v3604_v0 }
 0xd12   :  { %3348 = vmatprep.subr.bf16.mxu0 %v3604_v0  ;;  %3354 = vmatprep.subr.bf16.mxu1 %v3604_v0 }
 0xd17   :  { %3339 = vmatmul.mubr.msk.bf16.vlgmr.msra.gmra.mrb[76].mxu0 %vm279_vm3, %v2106_v35  ;;  %3345 = vmatmul.mubr.msk.bf16.vlgmr.msra.gmra.mrb[76].mxu1 %vm279_vm3, %v2107_v36 }
 0xd18   :  { %3350 = vmatprep.mubr.msk.bf16.mxu0 %vm3605_vm0, %v3604_v0  ;;  %3356 = vmatprep.mubr.msk.bf16.mxu1 %vm3605_vm0, %v3604_v0 }
 0xd19   :  { %3349 = vmatpush3.bf16.msra.mxu0 %v2489_v38  ;;  %3355 = vmatpush3.bf16.msra.mxu1 %v2536_v40 }
 0xd1a   :  { %3360 = vmatprep.subr.bf16.mxu0 %v3604_v0  ;;  %3366 = vmatprep.subr.bf16.mxu1 %v3604_v0 }
 0xdc1   :  { %v2148_v42 = vpop.f32.mrb[64].mxu0 }
 0xdc2   :  { %v2194_v43 = vpop.f32.mrb[64].mxu1  ;;  %v3304_v44 = vpop.f32.mrb[65].mxu0 }
 0xdc3   :  { %v2476_v45 = vpack.c.bf16 %v2194_v43, %v2148_v42  ;;  %v3310_v46 = vpop.f32.mrb[65].mxu1  ;;  %v2151_v47 = vpop.f32.mrb[66].mxu0  ;;  %v2988_v44 = vld [vmem:[%s4263_s7 + $0x1] ss:$0 sm:$0xff] }
 0xdc4   :  { %v2197_v49 = vpop.f32.mrb[66].mxu1  ;;  %v3305_v50 = vpop.f32.mrb[67].mxu0 }
 0xdc5   :  { %v3311_v51 = vpop.f32.mrb[67].mxu1  ;;  %3351 = vmatmul.mubr.msk.bf16.vlgmr.msra.gmra.mrb[80].mxu0 %vm279_vm3, %v2476_v45 }
 0xdc6   :  { %3361 = vmatpush3.bf16.msra.mxu0 %v2583_v48  ;;  %3362 = vmatprep.mubr.msk.bf16.mxu0 %vm3605_vm0, %v3604_v0 }
 0xdc7   :  { %3372 = vmatprep.subr.bf16.mxu0 %v3604_v0 }
 0xdda   :  { %v2240_v53 = vpop.f32.mrb[68].mxu0  ;;  %v2286_v54 = vpop.f32.mrb[68].mxu1 }
 0xddb   :  { %v2477_v22 = vpack.c.bf16 %v2286_v54, %v2240_v53  ;;  %v3316_v55 = vpop.f32.mrb[69].mxu0  ;;  %v3322_v56 = vpop.f32.mrb[69].mxu1 }
 0xddc   :  { %v2243_v58 = vpop.f32.mrb[70].mxu0  ;;  %v2289_v59 = vpop.f32.mrb[70].mxu1 }
 0xddd   :  { %v3317_v60 = vpop.f32.mrb[71].mxu0  ;;  %v3323_v25 = vpop.f32.mrb[71].mxu1  ;;  %3357 = vmatmul.mubr.msk.bf16.vlgmr.msra.gmra.mrb[80].mxu1 %vm279_vm3, %v2477_v22 }
 0xdde   :  { %3367 = vmatpush3.bf16.msra.mxu1 %v2630_v57  ;;  %3368 = vmatprep.mubr.msk.bf16.mxu1 %vm3605_vm0, %v3604_v0 }
 0xddf   :  { %3380 = vmatprep.subr.bf16.mxu1 %v3604_v0 }
 0xde2   :  { %v2332_v61 = vpop.f32.mrb[72].mxu0  ;;  %v2378_v12 = vpop.f32.mrb[72].mxu1 }
 0xde3   :  { %v2478_v62 = vpack.c.bf16 %v2378_v12, %v2332_v61  ;;  %v3328_v63 = vpop.f32.mrb[73].mxu0  ;;  %v3334_v1 = vpop.f32.mrb[73].mxu1 }
 0xde4   :  { %v2335_v2 = vpop.f32.mrb[74].mxu0  ;;  %v2381_v3 = vpop.f32.mrb[74].mxu1  ;;  %v3520_v63 = vld [vmem:[%s4264_s10 + $0x18] sm:$0xff]  }
 0xde5   :  { %v3329_v4 = vpop.f32.mrb[75].mxu0  ;;  %v3335_v5 = vpop.f32.mrb[75].mxu1  ;;  %3363 = vmatmul.mubr.msk.bf16.vlgmr.msra.gmra.mrb[84].mxu0 %vm279_vm3, %v2478_v62 }
 0xde6   :  { %3376 = vmatprep.mubr.msk.bf16.mxu0 %vm3605_vm0, %v3604_v0 }
 0xdea   :  { %v2424_v7 = vpop.f32.mrb[76].mxu0  ;;  %v2470_v8 = vpop.f32.mrb[76].mxu1 }
 0xdeb   :  { %v2479_v10 = vpack.c.bf16 %v2470_v8, %v2424_v7  ;;  %v3340_v11 = vpop.f32.mrb[77].mxu0  ;;  %v3346_v6 = vpop.f32.mrb[77].mxu1 }
 0xdec   :  { %v2427_v9 = vpop.f32.mrb[78].mxu0  ;;  %v2473_v13 = vpop.f32.mrb[78].mxu1 }
 0xded   :  { %v3341_v17 = vpop.f32.mrb[79].mxu0  ;;  %v3347_v18 = vpop.f32.mrb[79].mxu1  ;;  %3369 = vmatmul.mubr.msk.bf16.vlgmr.msra.gmra.mrb[84].mxu1 %vm279_vm3, %v2479_v10  ;;  %v2989_v10 = vld [vmem:[%s4265_s8 + $0x1] ss:$0 sm:$0xff] }
 0xdee   :  { %3384 = vmatprep.mubr.msk.bf16.mxu1 %vm3605_vm0, %v3604_v0  ;;  %v2990_v17 = vld [vmem:[%s4266_s9 + $0x1] ss:$0 sm:$0xff] }
 0xe98   :  { %v2525_v20 = vpop.f32.mrb[80].mxu0 }
 0xe99   :  { %v3352_v14 = vpop.f32.mrb[81].mxu0  ;;  %v2673_v24 = vsel %vm142_vm2, %v2525_v20, 0.0 }
 0xe9a   :  { %v2528_v19 = vpop.f32.mrb[82].mxu0 }
 0xe9b   :  { %v3353_v21 = vpop.f32.mrb[83].mxu0  ;;  %v2680_v30 = vsel %vm142_vm2, %v2528_v19, 0.0 }
 0xe9c   :  { %v2995_v21 = vld [vmem:[%s4267_s11 + $0x1] ss:$0 sm:$0xff] }
 0xeb0   :  { %v2572_v23 = vpop.f32.mrb[80].mxu1 }
 0xeb1   :  { %v2674_v26 = vsel %vm142_vm2, %v2572_v23, 0.0  ;;  %v3358_v27 = vpop.f32.mrb[81].mxu1 }
 0xeb2   :  { %v2675_v28 = vadd.f32 %v2674_v26, %v2673_v24  ;;  %v2575_v29 = vpop.f32.mrb[82].mxu1 }
 0xeb3   :  { %v2681_v31 = vsel %vm142_vm2, %v2575_v29, 0.0  ;;  %v3359_v32 = vpop.f32.mrb[83].mxu1 }
 0xeb4   :  { %v2682_v33 = vadd.f32 %v2681_v31, %v2680_v30 }
 0xeb8   :  { %v2619_v34 = vpop.f32.mrb[84].mxu0 }
 0xeb9   :  { %v2676_v35 = vsel %vm142_vm2, %v2619_v34, 0.0  ;;  %v3364_v36 = vpop.f32.mrb[85].mxu0 }
 0xeba   :  { %v2677_v37 = vadd.f32 %v2676_v35, %v2675_v28  ;;  %v2622_v38 = vpop.f32.mrb[86].mxu0 }
 0xebb   :  { %v2683_v39 = vsel %vm142_vm2, %v2622_v38, 0.0  ;;  %v3365_v40 = vpop.f32.mrb[87].mxu0 }
 0xebc   :  { %v2684_v41 = vadd.f32 %v2683_v39, %v2682_v33 }
 0xec0   :  { %v2666_v42 = vpop.f32.mrb[84].mxu1 }
 0xec1   :  { %v2678_v43 = vsel %vm142_vm2, %v2666_v42, 0.0  ;;  %v3370_v45 = vpop.f32.mrb[85].mxu1 }
 0xec2   :  { %v2679_v46 = vadd.f32 %v2678_v43, %v2677_v37  ;;  %v2669_v47 = vpop.f32.mrb[86].mxu1 }
 0xec3   :  { %v2685_v48 = vsel %vm142_vm2, %v2669_v47, 0.0  ;;  %v3371_v49 = vpop.f32.mrb[87].mxu1  ;;  %v3522_v47 = vld [vmem:[%s4270_s14 + $0x8] sm:$0xff]  }
 0xec4   :  { %v2692_v50 = vadd.f32 %v2988_v44, %v2679_v46  ;;  %v2686_v51 = vadd.f32 %v2685_v48, %v2684_v41  ;;  %v3521_v46 = vld [vmem:[%s4270_s14] sm:$0xff]  }
 0xec5   :  { %3381 = vmatpush3.bf16.msra.mxu1 %v3521_v46 }
 0xec6   :  { %v2693_v52 = vadd.f32 %v2988_v44, %v2686_v51  ;;  %v2694_v53 = vadd.f32 %v2692_v50, %v3999_v15  ;;  %3382 = vmatprep.subr.bf16.mxu1 %v3604_v0 }
 0xec8   :  { %v2698_v54 = vsel %vm142_vm2, %v2694_v53, 0.0  ;;  %v2695_v22 = vadd.f32 %v2693_v52, %v4001_v16  ;;  %v3519_v16 = vld [vmem:[%s4264_s10 + $0x10] sm:$0xff]  }
 0xec9   :  { %2699 = vadd.xlane.f32.xlu1 %v2698_v54  ;;  %3373 = vmatpush3.bf16.msra.mxu0 %v3519_v16 }
 0xeca   :  { %v2701_v55 = vsel %vm142_vm2, %v2695_v22, 0.0  ;;  %3374 = vmatprep.subr.bf16.mxu0 %v3604_v0  ;;  %3383 = vmatpush3.bf16.msra.mxu1 %v3522_v47  ;;  %v3000_v0 = vld [vmem:[%s4269_s13 + $0x1] ss:$0 sm:$0xff] }
 0xecb   :  { %2702 = vadd.xlane.f32.xlu0 %v2701_v55 }
 0xecd   :  { %3375 = vmatpush3.bf16.msra.mxu0 %v3520_v63 }
 0xf56   :  { %v2700_v56 = vpop.xlane.xlu1 %2699 }
 0xf57   :  { %v2704_v57 = vmul.f32 0.03125, %v2700_v56 }
 0xf58   :  { %v2703_v58 = vpop.xlane.xlu0 %2702 }
 0xf59   :  { %v2706_v59 = vsub.f32 %v2694_v53, %v2704_v57  ;;  %v2705_v60 = vmul.f32 0.03125, %v2703_v58 }
 0xf5b   :  { %v2707_v25 = vsub.f32 %v2695_v22, %v2705_v60  ;;  %v2708_v61 = vmul.f32 %v2706_v59, %v2706_v59  ;;  %v2999_v22 = vld [vmem:[%s4268_s12 + $0x1] ss:$0 sm:$0xff] }
 0xf5d   :  { %v2710_v12 = vsel %vm142_vm2, %v2708_v61, 0.0  ;;  %v2709_v62 = vmul.f32 %v2707_v25, %v2707_v25 }
 0xf5e   :  { %2711 = vadd.xlane.f32.xlu1 %v2710_v12  ;;  %v3001_v12 = vld [vmem:[%s4271_s15] ss:$0 sm:$0xff] }
 0xf5f   :  { %v2713_v15 = vsel %vm142_vm2, %v2709_v62, 0.0 }
 0xf60   :  { %2714 = vadd.xlane.f32.xlu0 %v2713_v15 }
 0xfeb   :  { %v2712_v1 = vpop.xlane.xlu1 %2711 }
 0xfec   :  { %v2716_v2 = vmul.f32 0.03125, %v2712_v1 }
 0xfed   :  { %v2715_v3 = vpop.xlane.xlu0 %2714 }
 0xfee   :  { %v2718_v4 = vadd.f32 1e-05, %v2716_v2  ;;  %v2717_v5 = vmul.f32 0.03125, %v2715_v3 }
 0xff0   :  { %3595 = vrsqrt.f32 %v2718_v4  ;;  %v2719_v7 = vadd.f32 1e-05, %v2717_v5 }
 0xff2   :  { %3597 = vrsqrt.f32 %v2719_v7 }
 0xffa   :  { %v3596_v8 = vpop.eup %3595 }
 0xffb   :  { %v2722_v11 = vmul.f32 %v3596_v8, %v2706_v59 }
 0xffc   :  { %v3598_v6 = vpop.eup %3597 }
 0xffd   :  { %v2728_v9 = vmul.f32 %v2989_v10, %v2722_v11  ;;  %v2723_v13 = vmul.f32 %v3598_v6, %v2707_v25 }
 0xfff   :  { %v2729_v18 = vmul.f32 %v2989_v10, %v2723_v13  ;;  %v2734_v20 = vadd.f32 %v2990_v17, %v2728_v9 }
0x1001   :  { %v2735_v14 = vadd.f32 %v2990_v17, %v2729_v18 }
0x1003   :  { %v2736_v19 = vpack.c.bf16 %v2735_v14, %v2734_v20 }
0x1005   :  { %3377 = vmatmul.mubr.msk.bf16.vlgmr.msra.gmra.mrb[88].mxu0 %vm142_vm2, %v2736_v19 }
0x10d8   :  { %v2796_v23 = vpop.f32.mrb[88].mxu0 }
0x10d9   :  { %v2797_v24 = vadd.f32 %v2995_v21, %v2796_v23  ;;  %v3378_v26 = vpop.f32.mrb[89].mxu0 }
0x10da   :  { %v2799_v27 = vpop.f32.mrb[90].mxu0 }
0x10db   :  { %v2803_v28 = vmax.f32 %v2797_v24, 0.0  ;;  %v2800_v29 = vadd.f32 %v2995_v21, %v2799_v27  ;;  %v3379_v30 = vpop.f32.mrb[91].mxu0 }
0x10dd   :  { %v2804_v31 = vmax.f32 %v2800_v29, 0.0  ;;  %v2805_v32 = vadd.f32 %v2803_v28, %v2734_v20 }
0x10df   :  { %v2809_v33 = vsel %vm142_vm2, %v2805_v32, 0.0  ;;  %v2806_v34 = vadd.f32 %v2804_v31, %v2735_v14 }
0x10e0   :  { %2810 = vadd.xlane.f32.xlu1 %v2809_v33 }
0x10e1   :  { %v2812_v35 = vsel %vm142_vm2, %v2806_v34, 0.0 }
0x10e2   :  { %2813 = vadd.xlane.f32.xlu0 %v2812_v35 }
0x116d   :  { %v2811_v36 = vpop.xlane.xlu1 %2810 }
0x116e   :  { %v2815_v37 = vmul.f32 0.03125, %v2811_v36 }
0x116f   :  { %v2814_v38 = vpop.xlane.xlu0 %2813 }
0x1170   :  { %v2817_v39 = vsub.f32 %v2805_v32, %v2815_v37  ;;  %v2816_v40 = vmul.f32 0.03125, %v2814_v38 }
0x1172   :  { %v2818_v41 = vsub.f32 %v2806_v34, %v2816_v40  ;;  %v2819_v42 = vmul.f32 %v2817_v39, %v2817_v39 }
0x1174   :  { %v2821_v43 = vsel %vm142_vm2, %v2819_v42, 0.0  ;;  %v2820_v44 = vmul.f32 %v2818_v41, %v2818_v41 }
0x1175   :  { %2822 = vadd.xlane.f32.xlu1 %v2821_v43 }
0x1176   :  { %v2824_v45 = vsel %vm142_vm2, %v2820_v44, 0.0 }
0x1177   :  { %2825 = vadd.xlane.f32.xlu0 %v2824_v45 }
0x1202   :  { %v2823_v48 = vpop.xlane.xlu1 %2822 }
0x1203   :  { %v2827_v49 = vmul.f32 0.03125, %v2823_v48 }
0x1204   :  { %v2826_v50 = vpop.xlane.xlu0 %2825 }
0x1205   :  { %v2829_v51 = vadd.f32 1e-05, %v2827_v49  ;;  %v2828_v52 = vmul.f32 0.03125, %v2826_v50 }
0x1207   :  { %3599 = vrsqrt.f32 %v2829_v51  ;;  %v2830_v53 = vadd.f32 1e-05, %v2828_v52 }
0x1209   :  { %3601 = vrsqrt.f32 %v2830_v53 }
0x1211   :  { %v3600_v54 = vpop.eup %3599 }
0x1212   :  { %v2833_v55 = vmul.f32 %v3600_v54, %v2817_v39 }
0x1213   :  { %v3602_v56 = vpop.eup %3601 }
0x1214   :  { %v2839_v57 = vmul.f32 %v2999_v22, %v2833_v55  ;;  %v2834_v58 = vmul.f32 %v3602_v56, %v2818_v41 }
0x1216   :  { %v2840_v59 = vmul.f32 %v2999_v22, %v2834_v58  ;;  %v2845_v60 = vadd.f32 %v3000_v0, %v2839_v57 }
0x1218   :  { %v2846_v25 = vadd.f32 %v3000_v0, %v2840_v59 }
0x121a   :  { %v2847_v61 = vpack.c.bf16 %v2846_v25, %v2845_v60 }
0x121c   :  { %3385 = vmatmul.mubr.msk.bf16.vlgmr.msra.gmra.mrb[88].mxu1 %vm142_vm2, %v2847_v61 }
0x12ef   :  { %v2908_v62 = vpop.f32.mrb[88].mxu1 }
0x12f0   :  { %v2909_v15 = vadd.f32 %v3001_v12, %v2908_v62  ;;  %v3386_v16 = vpop.f32.mrb[89].mxu1 }
0x12f1   :  { %v2911_v63 = vpop.f32.mrb[90].mxu1 }
0x12f2   :  { %2915 = vst [vmem:[%s4272_s16] sm:$0xff] %v2909_v15  ;;  %v2912_v1 = vadd.f32 %v3001_v12, %v2911_v63  ;;  %v3387_v2 = vpop.f32.mrb[91].mxu1 }
0x12f4   :  { %2916 = vst [vmem:[%s4272_s16 + $0x8] sm:$0xff] %v2912_v1 }

</bundles_post_ra>
